<compile_context>
chip_gen: v6e
topology: v6e:2x2x1
jax: 0.10.0
libtpu: 0.0.40
codegen_flags: <defaults>
</compile_context>

<pallas_src>
import math
from functools import partial

import jax
import jax.numpy as jnp
from jax.experimental import pallas as pl
from jax.experimental.pallas import tpu as pltpu


# ----------------------------- Pallas kernels -----------------------------

def _gcn_kernel(*refs, relu, has_score, softmax_classes):
    """Fused GCNConv(improved=True):
         out = D^-1/2 (A + 2I) D^-1/2 (X W) + b   [+ReLU] [+log_softmax epilogue]
       Optionally also emits the TopKPooling score tanh(out . p_unit) for the
       next pooling level (fused VPU/XLU reduction, no extra kernel launch)."""
    if has_score:
        x_ref, adj_ref, w_ref, b_ref, p_ref, o_ref, s_ref = refs
    else:
        x_ref, adj_ref, w_ref, b_ref, o_ref = refs
        p_ref = s_ref = None

    x = x_ref[...]
    adj = adj_ref[...]
    w = w_ref[...]
    b = b_ref[...]

    # X @ W on the MXU (f32 operands, f32 accumulation).
    xw = jnp.dot(x, w, preferred_element_type=jnp.float32)

    # improved=True: A_hat = A + 2I  ->  deg = rowsum(A) + 2  (always >= 2).
    deg = jnp.sum(adj, axis=1, keepdims=True) + 2.0
    dinv = jax.lax.rsqrt(deg)

    # Algebraic normalization: D^-1/2 (A + 2I) (D^-1/2 XW)
    xw_s = xw * dinv
    prop = jnp.dot(adj, xw_s, preferred_element_type=jnp.float32) + 2.0 * xw_s
    out = prop * dinv + b
    if relu:
        out = jnp.maximum(out, 0.0)

    if softmax_classes is not None:
        # Fused log_softmax over the first `softmax_classes` lanes of a
        # lane-dense (128-wide) output slab; padded lanes masked to -inf.
        col = jax.lax.broadcasted_iota(jnp.int32, out.shape, 1)
        logits = jnp.where(col < softmax_classes, out, -jnp.inf)
        m = jnp.max(logits, axis=-1, keepdims=True)
        s = logits - m
        lse = jnp.log(jnp.sum(jnp.exp(s), axis=-1, keepdims=True))
        out = s - lse

    o_ref[...] = out.astype(o_ref.dtype)

    if has_score:
        p = p_ref[...]                                   # (1, Cout), unit L2 norm
        raw = jnp.sum(out * p, axis=-1, keepdims=True)   # lane reduction (XLU)
        s_ref[...] = jnp.tanh(raw)


def _augment_adj_kernel(adj_ref, o_ref):
    """GraphUNet.augment_adj fused: (A + I) @ (A + I) with diagonal removed.
    (Self loops in the input, if any, are overwritten by the added unit loop.)"""
    a = adj_ref[...]
    n = a.shape[0]
    row = jax.lax.broadcasted_iota(jnp.int32, (n, n), 0)
    col = jax.lax.broadcasted_iota(jnp.int32, (n, n), 1)
    diag = row == col
    a_sl = jnp.where(diag, 1.0, a)
    a2 = jnp.dot(a_sl, a_sl, preferred_element_type=jnp.float32)
    o_ref[...] = jnp.where(diag, 0.0, a2).astype(o_ref.dtype)


# ----------------------------- Pallas wrappers -----------------------------

def gcn_conv(x, adj, weight, bias, *, relu, p_unit=None, softmax_classes=None):
    """One pallas_call per GCNConv (optionally + pooling score / log_softmax)."""
    x = x.astype(jnp.float32)
    adj = adj.astype(jnp.float32)
    M, Cin = x.shape
    Cout = weight.shape[1]
    bias2 = bias.reshape(1, Cout).astype(jnp.float32)
    has_score = p_unit is not None

    inputs = [x, adj, weight.astype(jnp.float32), bias2]
    in_specs = [
        pl.BlockSpec((M, Cin), lambda i: (0, 0)),
        pl.BlockSpec((M, M), lambda i: (0, 0)),
        pl.BlockSpec((Cin, Cout), lambda i: (0, 0)),
        pl.BlockSpec((1, Cout), lambda i: (0, 0)),
    ]
    if has_score:
        inputs.append(p_unit.reshape(1, Cout).astype(jnp.float32))
        in_specs.append(pl.BlockSpec((1, Cout), lambda i: (0, 0)))
        out_shape = (jax.ShapeDtypeStruct((M, Cout), jnp.float32),
                     jax.ShapeDtypeStruct((M, 1), jnp.float32))
        out_specs = (pl.BlockSpec((M, Cout), lambda i: (0, 0)),
                     pl.BlockSpec((M, 1), lambda i: (0, 0)))
    else:
        out_shape = jax.ShapeDtypeStruct((M, Cout), jnp.float32)
        out_specs = pl.BlockSpec((M, Cout), lambda i: (0, 0))

    # TODO(synk): for large graphs, tile over M (parallel grid axis so v7x's two
    # TensorCores split rows) and over K, and set vmem_limit_bytes; at N<=48 a
    # single full-array block per kernel is optimal.
    return pl.pallas_call(
        partial(_gcn_kernel, relu=relu, has_score=has_score,
                softmax_classes=softmax_classes),
        out_shape=out_shape,
        grid=(1,),
        in_specs=in_specs,
        out_specs=out_specs,
        compiler_params=pltpu.CompilerParams(dimension_semantics=("arbitrary",)),
    )(*inputs)


def augment_adj(adj):
    n = adj.shape[0]
    return pl.pallas_call(
        _augment_adj_kernel,
        out_shape=jax.ShapeDtypeStruct((n, n), jnp.float32),
        grid=(1,),
        in_specs=[pl.BlockSpec((n, n), lambda i: (0, 0))],
        out_specs=pl.BlockSpec((n, n), lambda i: (0, 0)),
        compiler_params=pltpu.CompilerParams(dimension_semantics=("arbitrary",)),
    )(adj.astype(jnp.float32))


# ----------------------------- Pooling (data-dependent XLA glue) ----------

def _round_up(v, m):
    return ((v + m - 1) // m) * m


def topk_pool(x, adj, score, n_real, ratio):
    """TopKPooling selection. `score` = tanh((x.p)/||p||) already produced by the
    preceding fused GCN kernel. Keeps ceil(ratio * n_real) nodes, padded up to a
    sublane multiple of 8; padded rows are zeroed in x and adj (rows + cols)."""
    M = x.shape[0]
    k_real = int(math.ceil(ratio * n_real))
    k_pad = min(_round_up(k_real, 8), M)
    valid_in = jnp.arange(M) < n_real
    masked = jnp.where(valid_in, score, -jnp.inf)
    perm = jnp.argsort(-masked)[:k_pad]                       # top-k selection
    gate = (jnp.arange(k_pad) < k_real).astype(x.dtype)
    sc = score[perm] * gate
    x_new = x[perm] * sc[:, None]
    adj_new = adj[perm][:, perm] * gate[:, None] * gate[None, :]
    return x_new, adj_new, perm, k_real


# ----------------------------- Parameters ----------------------------------

def _glorot(key, shape):
    fan_in, fan_out = shape
    s = math.sqrt(6.0 / (fan_in + fan_out))
    return jax.random.uniform(key, shape, jnp.float32, -s, s)


def init_params(key, in_ch=9, channels=(64, 128, 256), num_classes=8, depth=2):
    keys = jax.random.split(key, 16)
    dims_down = [in_ch] + list(channels)
    params = {
        "down_w": [_glorot(keys[i], (dims_down[i], dims_down[i + 1]))
                   for i in range(depth + 1)],
        "down_b": [jnp.zeros((dims_down[i + 1],), jnp.float32)
                   for i in range(depth + 1)],
        "pool_p": [jax.random.uniform(keys[4 + i], (channels[i],), jnp.float32, -1.0, 1.0)
                   for i in range(depth)],
    }
    # sum_res=False -> concat(res, up): up0: (c2+c1)->c1, up1: (c1+c0)->num_classes
    up_in = [channels[2] + channels[1], channels[1] + channels[0]]
    up_out = [channels[1], num_classes]
    params["up_w"] = [_glorot(keys[8 + i], (up_in[i], up_out[i])) for i in range(depth)]
    params["up_b"] = [jnp.zeros((up_out[i],), jnp.float32) for i in range(depth)]
    return params


# ----------------------------- Forward --------------------------------------

def gunet_seg_forward(params, x_feat, pos, adj, pool_ratios=(0.8, 0.8), depth=2):
    num_classes = params["up_w"][depth - 1].shape[1]

    # x0 = torch.cat([data.x, data.pos], dim=-1)
    x0 = jnp.concatenate([x_feat, pos], axis=-1)
    n0 = x0.shape[0]

    p_units = [p / jnp.linalg.norm(p) for p in params["pool_p"]]

    # --- GraphUNet down path ---
    x, score = gcn_conv(x0, adj, params["down_w"][0], params["down_b"][0],
                        relu=True, p_unit=p_units[0])
    xs, adjs, perms, kreals = [x], [adj], [], []
    cur_adj = adj
    cur_n = n0
    for i in range(1, depth + 1):
        cur_adj = augment_adj(cur_adj)
        x, cur_adj, perm, k_real = topk_pool(x, cur_adj, score[:, 0], cur_n,
                                             pool_ratios[i - 1])
        cur_n = k_real
        if i < depth:
            x, score = gcn_conv(x, cur_adj, params["down_w"][i], params["down_b"][i],
                                relu=True, p_unit=p_units[i])
            xs.append(x)
            adjs.append(cur_adj)
        else:
            x = gcn_conv(x, cur_adj, params["down_w"][i], params["down_b"][i],
                         relu=True)
        perms.append(perm)
        kreals.append(k_real)

    # --- GraphUNet up path (sum_res=False -> concat skip) ---
    for i in range(depth):
        j = depth - 1 - i
        res, a_j, perm, k_real = xs[j], adjs[j], perms[j], kreals[j]
        up = jnp.zeros((res.shape[0], x.shape[1]), x.dtype)
        up = up.at[perm[:k_real]].set(x[:k_real])     # only real (unpadded) rows
        x = jnp.concatenate([res, up], axis=-1)
        if i < depth - 1:
            x = gcn_conv(x, a_j, params["up_w"][i], params["up_b"][i], relu=True)
        else:
            # Last conv: lane-pad classes to 128, fuse log_softmax in-kernel.
            w = params["up_w"][i]
            b = params["up_b"][i]
            w_pad = jnp.zeros((w.shape[0], 128), jnp.float32).at[:, :num_classes].set(w)
            b_pad = jnp.zeros((128,), jnp.float32).at[:num_classes].set(b)
            x = gcn_conv(x, a_j, w_pad, b_pad, relu=False,
                         softmax_classes=num_classes)
            x = x[:, :num_classes]
    return x


# ----------------------------- Main ------------------------------------------

if __name__ == "__main__":
    key = jax.random.PRNGKey(0)
    k_x, k_pos, k_e, k_params = jax.random.split(key, 4)

    num_nodes, num_feat, num_classes = 48, 6, 8   # data.x:(N,6), data.pos:(N,3) -> 9 feats

    x_feat = jax.random.normal(k_x, (num_nodes, num_feat), jnp.float32)
    pos = jax.random.normal(k_pos, (num_nodes, 3), jnp.float32)

    # Random undirected edge set -> dense adjacency with unit edge weights.
    num_edges = 128
    src = jax.random.randint(k_e, (num_edges,), 0, num_nodes)
    dst = jax.random.randint(jax.random.fold_in(k_e, 1), (num_edges,), 0, num_nodes)
    w = jnp.where(src != dst, 1.0, 0.0)   # drop self loops
    adj = jnp.zeros((num_nodes, num_nodes), jnp.float32).at[src, dst].set(w)
    adj = jnp.maximum(adj, adj.T)         # symmetric (undirected) graph

    params = init_params(k_params, in_ch=num_feat + 3, channels=(64, 128, 256),
                         num_classes=num_classes, depth=2)

    fwd = jax.jit(gunet_seg_forward)
    out = fwd(params, x_feat, pos, adj)
    out = jax.block_until_ready(out)
    assert out.shape == (num_nodes, num_classes)
    assert bool(jnp.all(jnp.isfinite(out)))
    print("KERNEL_OK")
</pallas_src>

<mosaic_0001>
module attributes {stable_mosaic.version = 11 : i64} {
  func.func @_gcn_kernel(%arg0: i32, %arg1: memref<48x9xf32, #tpu.memory_space<vmem>>, %arg2: memref<48x48xf32, #tpu.memory_space<vmem>>, %arg3: memref<9x64xf32, #tpu.memory_space<vmem>>, %arg4: memref<1x64xf32, #tpu.memory_space<vmem>>, %arg5: memref<1x64xf32, #tpu.memory_space<vmem>>, %arg6: memref<48x64xf32, #tpu.memory_space<vmem>>, %arg7: memref<48x1xf32, #tpu.memory_space<vmem>>) attributes {dimension_semantics = [#tpu.dimension_semantics<arbitrary>], iteration_bounds = array<i64: 1>, scalar_prefetch = 0 : i64, scratch_operands = 0 : i64, tpu.core_type = #tpu.core_type<tc>, window_params = [{pipeline_mode = #tpu.pipeline_mode<synchronous>, transform_indices = @transform_0, window_bounds = array<i64: 48, 9>}, {pipeline_mode = #tpu.pipeline_mode<synchronous>, transform_indices = @transform_1, window_bounds = array<i64: 48, 48>}, {pipeline_mode = #tpu.pipeline_mode<synchronous>, transform_indices = @transform_2, window_bounds = array<i64: 9, 64>}, {pipeline_mode = #tpu.pipeline_mode<synchronous>, transform_indices = @transform_3, window_bounds = array<i64: 1, 64>}, {pipeline_mode = #tpu.pipeline_mode<synchronous>, transform_indices = @transform_4, window_bounds = array<i64: 1, 64>}, {pipeline_mode = #tpu.pipeline_mode<synchronous>, transform_indices = @transform_5, window_bounds = array<i64: 48, 64>}, {pipeline_mode = #tpu.pipeline_mode<synchronous>, transform_indices = @transform_6, window_bounds = array<i64: 48, 1>}]} {
    %c0 = arith.constant 0 : index
    %c0_0 = arith.constant 0 : index
    %0 = vector.load %arg1[%c0, %c0_0] : memref<48x9xf32, #tpu.memory_space<vmem>>, vector<48x9xf32>
    %c0_1 = arith.constant 0 : index
    %c0_2 = arith.constant 0 : index
    %1 = vector.load %arg2[%c0_1, %c0_2] : memref<48x48xf32, #tpu.memory_space<vmem>>, vector<48x48xf32>
    %c0_3 = arith.constant 0 : index
    %c0_4 = arith.constant 0 : index
    %2 = vector.load %arg3[%c0_3, %c0_4] : memref<9x64xf32, #tpu.memory_space<vmem>>, vector<9x64xf32>
    %c0_5 = arith.constant 0 : index
    %c0_6 = arith.constant 0 : index
    %3 = vector.load %arg4[%c0_5, %c0_6] : memref<1x64xf32, #tpu.memory_space<vmem>>, vector<1x64xf32>
    %cst = arith.constant dense<0.000000e+00> : vector<48x64xf32>
    %4 = tpu.matmul %0, %2, %cst {dimension_numbers = #tpu.dot_dimension_numbers<[1], [0], [0], [1], [0, 0, 1, 1], [], []>} : vector<48x9xf32>, vector<9x64xf32>, vector<48x64xf32> -> vector<48x64xf32>
    %cst_7 = arith.constant dense<0.000000e+00> : vector<48xf32>
    %5 = vector.multi_reduction <add>, %1, %cst_7 [1] : vector<48x48xf32> to vector<48xf32>
    %6 = vector.shape_cast %5 : vector<48xf32> to vector<48x1xf32>
    %cst_8 = arith.constant 2.000000e+00 : f32
    %7 = vector.broadcast %cst_8 : f32 to vector<48x1xf32>
    %8 = arith.addf %6, %7 : vector<48x1xf32>
    %9 = math.rsqrt %8 : vector<48x1xf32>
    %10 = vector.broadcast %9 : vector<48x1xf32> to vector<48x64xf32>
    %11 = arith.mulf %4, %10 : vector<48x64xf32>
    %cst_9 = arith.constant dense<0.000000e+00> : vector<48x64xf32>
    %12 = tpu.matmul %1, %11, %cst_9 {dimension_numbers = #tpu.dot_dimension_numbers<[1], [0], [0], [1], [0, 0, 1, 1], [], []>} : vector<48x48xf32>, vector<48x64xf32>, vector<48x64xf32> -> vector<48x64xf32>
    %cst_10 = arith.constant 2.000000e+00 : f32
    %13 = vector.broadcast %cst_10 : f32 to vector<48x64xf32>
    %14 = arith.mulf %13, %11 : vector<48x64xf32>
    %15 = arith.addf %12, %14 : vector<48x64xf32>
    %16 = vector.broadcast %9 : vector<48x1xf32> to vector<48x64xf32>
    %17 = arith.mulf %15, %16 : vector<48x64xf32>
    %18 = vector.broadcast %3 : vector<1x64xf32> to vector<48x64xf32>
    %19 = arith.addf %17, %18 : vector<48x64xf32>
    %cst_11 = arith.constant 0.000000e+00 : f32
    %20 = vector.broadcast %cst_11 : f32 to vector<48x64xf32>
    %21 = arith.maximumf %19, %20 : vector<48x64xf32>
    %c0_12 = arith.constant 0 : index
    %c0_13 = arith.constant 0 : index
    %22 = vector.load %arg6[%c0_12, %c0_13] : memref<48x64xf32, #tpu.memory_space<vmem>>, vector<48x64xf32>
    tpu.vector_store %arg6[%c0_12, %c0_13], %21 {strides = array<i32>} : memref<48x64xf32, #tpu.memory_space<vmem>>, vector<48x64xf32>,
    %c0_14 = arith.constant 0 : index
    %c0_15 = arith.constant 0 : index
    %23 = vector.load %arg5[%c0_14, %c0_15] : memref<1x64xf32, #tpu.memory_space<vmem>>, vector<1x64xf32>
    %24 = vector.broadcast %23 : vector<1x64xf32> to vector<48x64xf32>
    %25 = arith.mulf %21, %24 : vector<48x64xf32>
    %cst_16 = arith.constant dense<0.000000e+00> : vector<48xf32>
    %26 = vector.multi_reduction <add>, %25, %cst_16 [1] : vector<48x64xf32> to vector<48xf32>
    %27 = vector.shape_cast %26 : vector<48xf32> to vector<48x1xf32>
    %28 = math.tanh %27 : vector<48x1xf32>
    %c0_17 = arith.constant 0 : index
    %c0_18 = arith.constant 0 : index
    %29 = vector.load %arg7[%c0_17, %c0_18] : memref<48x1xf32, #tpu.memory_space<vmem>>, vector<48x1xf32>
    tpu.vector_store %arg7[%c0_17, %c0_18], %28 {strides = array<i32>} : memref<48x1xf32, #tpu.memory_space<vmem>>, vector<48x1xf32>,
    return
  }
  func.func @transform_0(%arg0: i32) -> (i32, i32) {
    %c0_i32 = arith.constant 0 : i32
    %c0_i32_0 = arith.constant 0 : i32
    %c0_i32_1 = arith.constant 0 : i32
    return %c0_i32, %c0_i32_0 : i32, i32
  }
  func.func @transform_1(%arg0: i32) -> (i32, i32) {
    %c0_i32 = arith.constant 0 : i32
    %c0_i32_0 = arith.constant 0 : i32
    %c0_i32_1 = arith.constant 0 : i32
    return %c0_i32, %c0_i32_0 : i32, i32
  }
  func.func @transform_2(%arg0: i32) -> (i32, i32) {
    %c0_i32 = arith.constant 0 : i32
    %c0_i32_0 = arith.constant 0 : i32
    %c0_i32_1 = arith.constant 0 : i32
    return %c0_i32, %c0_i32_0 : i32, i32
  }
  func.func @transform_3(%arg0: i32) -> (i32, i32) {
    %c0_i32 = arith.constant 0 : i32
    %c0_i32_0 = arith.constant 0 : i32
    %c0_i32_1 = arith.constant 0 : i32
    return %c0_i32, %c0_i32_0 : i32, i32
  }
  func.func @transform_4(%arg0: i32) -> (i32, i32) {
    %c0_i32 = arith.constant 0 : i32
    %c0_i32_0 = arith.constant 0 : i32
    %c0_i32_1 = arith.constant 0 : i32
    return %c0_i32, %c0_i32_0 : i32, i32
  }
  func.func @transform_5(%arg0: i32) -> (i32, i32) {
    %c0_i32 = arith.constant 0 : i32
    %c0_i32_0 = arith.constant 0 : i32
    %c0_i32_1 = arith.constant 0 : i32
    return %c0_i32, %c0_i32_0 : i32, i32
  }
  func.func @transform_6(%arg0: i32) -> (i32, i32) {
    %c0_i32 = arith.constant 0 : i32
    %c0_i32_0 = arith.constant 0 : i32
    %c0_i32_1 = arith.constant 0 : i32
    return %c0_i32, %c0_i32_0 : i32, i32
  }
}

module attributes {stable_mosaic.version = 11 : i64} {
  func.func @_augment_adj_kernel(%arg0: i32, %arg1: memref<48x48xf32, #tpu.memory_space<vmem>>, %arg2: memref<48x48xf32, #tpu.memory_space<vmem>>) attributes {dimension_semantics = [#tpu.dimension_semantics<arbitrary>], iteration_bounds = array<i64: 1>, scalar_prefetch = 0 : i64, scratch_operands = 0 : i64, tpu.core_type = #tpu.core_type<tc>, window_params = [{pipeline_mode = #tpu.pipeline_mode<synchronous>, transform_indices = @transform_0, window_bounds = array<i64: 48, 48>}, {pipeline_mode = #tpu.pipeline_mode<synchronous>, transform_indices = @transform_1, window_bounds = array<i64: 48, 48>}]} {
    %c0 = arith.constant 0 : index
    %c0_0 = arith.constant 0 : index
    %0 = vector.load %arg1[%c0, %c0_0] : memref<48x48xf32, #tpu.memory_space<vmem>>, vector<48x48xf32>
    %1 = tpu.iota {dimensions = array<i32: 0>} : vector<48x48xi32>
    %2 = tpu.iota {dimensions = array<i32: 1>} : vector<48x48xi32>
    %3 = arith.cmpi eq, %1, %2 : vector<48x48xi32>
    %cst = arith.constant 1.000000e+00 : f32
    %4 = vector.broadcast %cst : f32 to vector<48x48xf32>
    %5 = arith.select %3, %4, %0 : vector<48x48xi1>, vector<48x48xf32>
    %cst_1 = arith.constant dense<0.000000e+00> : vector<48x48xf32>
    %6 = tpu.matmul %5, %5, %cst_1 {dimension_numbers = #tpu.dot_dimension_numbers<[1], [0], [0], [1], [0, 0, 1, 1], [], []>} : vector<48x48xf32>, vector<48x48xf32>, vector<48x48xf32> -> vector<48x48xf32>
    %cst_2 = arith.constant 0.000000e+00 : f32
    %7 = vector.broadcast %cst_2 : f32 to vector<48x48xf32>
    %8 = arith.select %3, %7, %6 : vector<48x48xi1>, vector<48x48xf32>
    %c0_3 = arith.constant 0 : index
    %c0_4 = arith.constant 0 : index
    %9 = vector.load %arg2[%c0_3, %c0_4] : memref<48x48xf32, #tpu.memory_space<vmem>>, vector<48x48xf32>
    tpu.vector_store %arg2[%c0_3, %c0_4], %8 {strides = array<i32>} : memref<48x48xf32, #tpu.memory_space<vmem>>, vector<48x48xf32>,
    return
  }
  func.func @transform_0(%arg0: i32) -> (i32, i32) {
    %c0_i32 = arith.constant 0 : i32
    %c0_i32_0 = arith.constant 0 : i32
    %c0_i32_1 = arith.constant 0 : i32
    return %c0_i32, %c0_i32_0 : i32, i32
  }
  func.func @transform_1(%arg0: i32) -> (i32, i32) {
    %c0_i32 = arith.constant 0 : i32
    %c0_i32_0 = arith.constant 0 : i32
    %c0_i32_1 = arith.constant 0 : i32
    return %c0_i32, %c0_i32_0 : i32, i32
  }
}

module attributes {stable_mosaic.version = 11 : i64} {
  func.func @_gcn_kernel(%arg0: i32, %arg1: memref<40x64xf32, #tpu.memory_space<vmem>>, %arg2: memref<40x40xf32, #tpu.memory_space<vmem>>, %arg3: memref<64x128xf32, #tpu.memory_space<vmem>>, %arg4: memref<1x128xf32, #tpu.memory_space<vmem>>, %arg5: memref<1x128xf32, #tpu.memory_space<vmem>>, %arg6: memref<40x128xf32, #tpu.memory_space<vmem>>, %arg7: memref<40x1xf32, #tpu.memory_space<vmem>>) attributes {dimension_semantics = [#tpu.dimension_semantics<arbitrary>], iteration_bounds = array<i64: 1>, scalar_prefetch = 0 : i64, scratch_operands = 0 : i64, tpu.core_type = #tpu.core_type<tc>, window_params = [{pipeline_mode = #tpu.pipeline_mode<synchronous>, transform_indices = @transform_0, window_bounds = array<i64: 40, 64>}, {pipeline_mode = #tpu.pipeline_mode<synchronous>, transform_indices = @transform_1, window_bounds = array<i64: 40, 40>}, {pipeline_mode = #tpu.pipeline_mode<synchronous>, transform_indices = @transform_2, window_bounds = array<i64: 64, 128>}, {pipeline_mode = #tpu.pipeline_mode<synchronous>, transform_indices = @transform_3, window_bounds = array<i64: 1, 128>}, {pipeline_mode = #tpu.pipeline_mode<synchronous>, transform_indices = @transform_4, window_bounds = array<i64: 1, 128>}, {pipeline_mode = #tpu.pipeline_mode<synchronous>, transform_indices = @transform_5, window_bounds = array<i64: 40, 128>}, {pipeline_mode = #tpu.pipeline_mode<synchronous>, transform_indices = @transform_6, window_bounds = array<i64: 40, 1>}]} {
    %c0 = arith.constant 0 : index
    %c0_0 = arith.constant 0 : index
    %0 = vector.load %arg1[%c0, %c0_0] : memref<40x64xf32, #tpu.memory_space<vmem>>, vector<40x64xf32>
    %c0_1 = arith.constant 0 : index
    %c0_2 = arith.constant 0 : index
    %1 = vector.load %arg2[%c0_1, %c0_2] : memref<40x40xf32, #tpu.memory_space<vmem>>, vector<40x40xf32>
    %c0_3 = arith.constant 0 : index
    %c0_4 = arith.constant 0 : index
    %2 = vector.load %arg3[%c0_3, %c0_4] : memref<64x128xf32, #tpu.memory_space<vmem>>, vector<64x128xf32>
    %c0_5 = arith.constant 0 : index
    %c0_6 = arith.constant 0 : index
    %3 = vector.load %arg4[%c0_5, %c0_6] : memref<1x128xf32, #tpu.memory_space<vmem>>, vector<1x128xf32>
    %cst = arith.constant dense<0.000000e+00> : vector<40x128xf32>
    %4 = tpu.matmul %0, %2, %cst {dimension_numbers = #tpu.dot_dimension_numbers<[1], [0], [0], [1], [0, 0, 1, 1], [], []>} : vector<40x64xf32>, vector<64x128xf32>, vector<40x128xf32> -> vector<40x128xf32>
    %cst_7 = arith.constant dense<0.000000e+00> : vector<40xf32>
    %5 = vector.multi_reduction <add>, %1, %cst_7 [1] : vector<40x40xf32> to vector<40xf32>
    %6 = vector.shape_cast %5 : vector<40xf32> to vector<40x1xf32>
    %cst_8 = arith.constant 2.000000e+00 : f32
    %7 = vector.broadcast %cst_8 : f32 to vector<40x1xf32>
    %8 = arith.addf %6, %7 : vector<40x1xf32>
    %9 = math.rsqrt %8 : vector<40x1xf32>
    %10 = vector.broadcast %9 : vector<40x1xf32> to vector<40x128xf32>
    %11 = arith.mulf %4, %10 : vector<40x128xf32>
    %cst_9 = arith.constant dense<0.000000e+00> : vector<40x128xf32>
    %12 = tpu.matmul %1, %11, %cst_9 {dimension_numbers = #tpu.dot_dimension_numbers<[1], [0], [0], [1], [0, 0, 1, 1], [], []>} : vector<40x40xf32>, vector<40x128xf32>, vector<40x128xf32> -> vector<40x128xf32>
    %cst_10 = arith.constant 2.000000e+00 : f32
    %13 = vector.broadcast %cst_10 : f32 to vector<40x128xf32>
    %14 = arith.mulf %13, %11 : vector<40x128xf32>
    %15 = arith.addf %12, %14 : vector<40x128xf32>
    %16 = vector.broadcast %9 : vector<40x1xf32> to vector<40x128xf32>
    %17 = arith.mulf %15, %16 : vector<40x128xf32>
    %18 = vector.broadcast %3 : vector<1x128xf32> to vector<40x128xf32>
    %19 = arith.addf %17, %18 : vector<40x128xf32>
    %cst_11 = arith.constant 0.000000e+00 : f32
    %20 = vector.broadcast %cst_11 : f32 to vector<40x128xf32>
    %21 = arith.maximumf %19, %20 : vector<40x128xf32>
    %c0_12 = arith.constant 0 : index
    %c0_13 = arith.constant 0 : index
    %22 = vector.load %arg6[%c0_12, %c0_13] : memref<40x128xf32, #tpu.memory_space<vmem>>, vector<40x128xf32>
    tpu.vector_store %arg6[%c0_12, %c0_13], %21 {strides = array<i32>} : memref<40x128xf32, #tpu.memory_space<vmem>>, vector<40x128xf32>,
    %c0_14 = arith.constant 0 : index
    %c0_15 = arith.constant 0 : index
    %23 = vector.load %arg5[%c0_14, %c0_15] : memref<1x128xf32, #tpu.memory_space<vmem>>, vector<1x128xf32>
    %24 = vector.broadcast %23 : vector<1x128xf32> to vector<40x128xf32>
    %25 = arith.mulf %21, %24 : vector<40x128xf32>
    %cst_16 = arith.constant dense<0.000000e+00> : vector<40xf32>
    %26 = vector.multi_reduction <add>, %25, %cst_16 [1] : vector<40x128xf32> to vector<40xf32>
    %27 = vector.shape_cast %26 : vector<40xf32> to vector<40x1xf32>
    %28 = math.tanh %27 : vector<40x1xf32>
    %c0_17 = arith.constant 0 : index
    %c0_18 = arith.constant 0 : index
    %29 = vector.load %arg7[%c0_17, %c0_18] : memref<40x1xf32, #tpu.memory_space<vmem>>, vector<40x1xf32>
    tpu.vector_store %arg7[%c0_17, %c0_18], %28 {strides = array<i32>} : memref<40x1xf32, #tpu.memory_space<vmem>>, vector<40x1xf32>,
    return
  }
  func.func @transform_0(%arg0: i32) -> (i32, i32) {
    %c0_i32 = arith.constant 0 : i32
    %c0_i32_0 = arith.constant 0 : i32
    %c0_i32_1 = arith.constant 0 : i32
    return %c0_i32, %c0_i32_0 : i32, i32
  }
  func.func @transform_1(%arg0: i32) -> (i32, i32) {
    %c0_i32 = arith.constant 0 : i32
    %c0_i32_0 = arith.constant 0 : i32
    %c0_i32_1 = arith.constant 0 : i32
    return %c0_i32, %c0_i32_0 : i32, i32
  }
  func.func @transform_2(%arg0: i32) -> (i32, i32) {
    %c0_i32 = arith.constant 0 : i32
    %c0_i32_0 = arith.constant 0 : i32
    %c0_i32_1 = arith.constant 0 : i32
    return %c0_i32, %c0_i32_0 : i32, i32
  }
  func.func @transform_3(%arg0: i32) -> (i32, i32) {
    %c0_i32 = arith.constant 0 : i32
    %c0_i32_0 = arith.constant 0 : i32
    %c0_i32_1 = arith.constant 0 : i32
    return %c0_i32, %c0_i32_0 : i32, i32
  }
  func.func @transform_4(%arg0: i32) -> (i32, i32) {
    %c0_i32 = arith.constant 0 : i32
    %c0_i32_0 = arith.constant 0 : i32
    %c0_i32_1 = arith.constant 0 : i32
    return %c0_i32, %c0_i32_0 : i32, i32
  }
  func.func @transform_5(%arg0: i32) -> (i32, i32) {
    %c0_i32 = arith.constant 0 : i32
    %c0_i32_0 = arith.constant 0 : i32
    %c0_i32_1 = arith.constant 0 : i32
    return %c0_i32, %c0_i32_0 : i32, i32
  }
  func.func @transform_6(%arg0: i32) -> (i32, i32) {
    %c0_i32 = arith.constant 0 : i32
    %c0_i32_0 = arith.constant 0 : i32
    %c0_i32_1 = arith.constant 0 : i32
    return %c0_i32, %c0_i32_0 : i32, i32
  }
}

module attributes {stable_mosaic.version = 11 : i64} {
  func.func @_augment_adj_kernel(%arg0: i32, %arg1: memref<40x40xf32, #tpu.memory_space<vmem>>, %arg2: memref<40x40xf32, #tpu.memory_space<vmem>>) attributes {dimension_semantics = [#tpu.dimension_semantics<arbitrary>], iteration_bounds = array<i64: 1>, scalar_prefetch = 0 : i64, scratch_operands = 0 : i64, tpu.core_type = #tpu.core_type<tc>, window_params = [{pipeline_mode = #tpu.pipeline_mode<synchronous>, transform_indices = @transform_0, window_bounds = array<i64: 40, 40>}, {pipeline_mode = #tpu.pipeline_mode<synchronous>, transform_indices = @transform_1, window_bounds = array<i64: 40, 40>}]} {
    %c0 = arith.constant 0 : index
    %c0_0 = arith.constant 0 : index
    %0 = vector.load %arg1[%c0, %c0_0] : memref<40x40xf32, #tpu.memory_space<vmem>>, vector<40x40xf32>
    %1 = tpu.iota {dimensions = array<i32: 0>} : vector<40x40xi32>
    %2 = tpu.iota {dimensions = array<i32: 1>} : vector<40x40xi32>
    %3 = arith.cmpi eq, %1, %2 : vector<40x40xi32>
    %cst = arith.constant 1.000000e+00 : f32
    %4 = vector.broadcast %cst : f32 to vector<40x40xf32>
    %5 = arith.select %3, %4, %0 : vector<40x40xi1>, vector<40x40xf32>
    %cst_1 = arith.constant dense<0.000000e+00> : vector<40x40xf32>
    %6 = tpu.matmul %5, %5, %cst_1 {dimension_numbers = #tpu.dot_dimension_numbers<[1], [0], [0], [1], [0, 0, 1, 1], [], []>} : vector<40x40xf32>, vector<40x40xf32>, vector<40x40xf32> -> vector<40x40xf32>
    %cst_2 = arith.constant 0.000000e+00 : f32
    %7 = vector.broadcast %cst_2 : f32 to vector<40x40xf32>
    %8 = arith.select %3, %7, %6 : vector<40x40xi1>, vector<40x40xf32>
    %c0_3 = arith.constant 0 : index
    %c0_4 = arith.constant 0 : index
    %9 = vector.load %arg2[%c0_3, %c0_4] : memref<40x40xf32, #tpu.memory_space<vmem>>, vector<40x40xf32>
    tpu.vector_store %arg2[%c0_3, %c0_4], %8 {strides = array<i32>} : memref<40x40xf32, #tpu.memory_space<vmem>>, vector<40x40xf32>,
    return
  }
  func.func @transform_0(%arg0: i32) -> (i32, i32) {
    %c0_i32 = arith.constant 0 : i32
    %c0_i32_0 = arith.constant 0 : i32
    %c0_i32_1 = arith.constant 0 : i32
    return %c0_i32, %c0_i32_0 : i32, i32
  }
  func.func @transform_1(%arg0: i32) -> (i32, i32) {
    %c0_i32 = arith.constant 0 : i32
    %c0_i32_0 = arith.constant 0 : i32
    %c0_i32_1 = arith.constant 0 : i32
    return %c0_i32, %c0_i32_0 : i32, i32
  }
}

module attributes {stable_mosaic.version = 11 : i64} {
  func.func @_gcn_kernel(%arg0: i32, %arg1: memref<32x128xf32, #tpu.memory_space<vmem>>, %arg2: memref<32x32xf32, #tpu.memory_space<vmem>>, %arg3: memref<128x256xf32, #tpu.memory_space<vmem>>, %arg4: memref<1x256xf32, #tpu.memory_space<vmem>>, %arg5: memref<32x256xf32, #tpu.memory_space<vmem>>) attributes {dimension_semantics = [#tpu.dimension_semantics<arbitrary>], iteration_bounds = array<i64: 1>, scalar_prefetch = 0 : i64, scratch_operands = 0 : i64, tpu.core_type = #tpu.core_type<tc>, window_params = [{pipeline_mode = #tpu.pipeline_mode<synchronous>, transform_indices = @transform_0, window_bounds = array<i64: 32, 128>}, {pipeline_mode = #tpu.pipeline_mode<synchronous>, transform_indices = @transform_1, window_bounds = array<i64: 32, 32>}, {pipeline_mode = #tpu.pipeline_mode<synchronous>, transform_indices = @transform_2, window_bounds = array<i64: 128, 256>}, {pipeline_mode = #tpu.pipeline_mode<synchronous>, transform_indices = @transform_3, window_bounds = array<i64: 1, 256>}, {pipeline_mode = #tpu.pipeline_mode<synchronous>, transform_indices = @transform_4, window_bounds = array<i64: 32, 256>}]} {
    %c0 = arith.constant 0 : index
    %c0_0 = arith.constant 0 : index
    %0 = vector.load %arg1[%c0, %c0_0] : memref<32x128xf32, #tpu.memory_space<vmem>>, vector<32x128xf32>
    %c0_1 = arith.constant 0 : index
    %c0_2 = arith.constant 0 : index
    %1 = vector.load %arg2[%c0_1, %c0_2] : memref<32x32xf32, #tpu.memory_space<vmem>>, vector<32x32xf32>
    %c0_3 = arith.constant 0 : index
    %c0_4 = arith.constant 0 : index
    %2 = vector.load %arg3[%c0_3, %c0_4] : memref<128x256xf32, #tpu.memory_space<vmem>>, vector<128x256xf32>
    %c0_5 = arith.constant 0 : index
    %c0_6 = arith.constant 0 : index
    %3 = vector.load %arg4[%c0_5, %c0_6] : memref<1x256xf32, #tpu.memory_space<vmem>>, vector<1x256xf32>
    %cst = arith.constant dense<0.000000e+00> : vector<32x256xf32>
    %4 = tpu.matmul %0, %2, %cst {dimension_numbers = #tpu.dot_dimension_numbers<[1], [0], [0], [1], [0, 0, 1, 1], [], []>} : vector<32x128xf32>, vector<128x256xf32>, vector<32x256xf32> -> vector<32x256xf32>
    %cst_7 = arith.constant dense<0.000000e+00> : vector<32xf32>
    %5 = vector.multi_reduction <add>, %1, %cst_7 [1] : vector<32x32xf32> to vector<32xf32>
    %6 = vector.shape_cast %5 : vector<32xf32> to vector<32x1xf32>
    %cst_8 = arith.constant 2.000000e+00 : f32
    %7 = vector.broadcast %cst_8 : f32 to vector<32x1xf32>
    %8 = arith.addf %6, %7 : vector<32x1xf32>
    %9 = math.rsqrt %8 : vector<32x1xf32>
    %10 = vector.broadcast %9 : vector<32x1xf32> to vector<32x256xf32>
    %11 = arith.mulf %4, %10 : vector<32x256xf32>
    %cst_9 = arith.constant dense<0.000000e+00> : vector<32x256xf32>
    %12 = tpu.matmul %1, %11, %cst_9 {dimension_numbers = #tpu.dot_dimension_numbers<[1], [0], [0], [1], [0, 0, 1, 1], [], []>} : vector<32x32xf32>, vector<32x256xf32>, vector<32x256xf32> -> vector<32x256xf32>
    %cst_10 = arith.constant 2.000000e+00 : f32
    %13 = vector.broadcast %cst_10 : f32 to vector<32x256xf32>
    %14 = arith.mulf %13, %11 : vector<32x256xf32>
    %15 = arith.addf %12, %14 : vector<32x256xf32>
    %16 = vector.broadcast %9 : vector<32x1xf32> to vector<32x256xf32>
    %17 = arith.mulf %15, %16 : vector<32x256xf32>
    %18 = vector.broadcast %3 : vector<1x256xf32> to vector<32x256xf32>
    %19 = arith.addf %17, %18 : vector<32x256xf32>
    %cst_11 = arith.constant 0.000000e+00 : f32
    %20 = vector.broadcast %cst_11 : f32 to vector<32x256xf32>
    %21 = arith.maximumf %19, %20 : vector<32x256xf32>
    %c0_12 = arith.constant 0 : index
    %c0_13 = arith.constant 0 : index
    %22 = vector.load %arg5[%c0_12, %c0_13] : memref<32x256xf32, #tpu.memory_space<vmem>>, vector<32x256xf32>
    tpu.vector_store %arg5[%c0_12, %c0_13], %21 {strides = array<i32>} : memref<32x256xf32, #tpu.memory_space<vmem>>, vector<32x256xf32>,
    return
  }
  func.func @transform_0(%arg0: i32) -> (i32, i32) {
    %c0_i32 = arith.constant 0 : i32
    %c0_i32_0 = arith.constant 0 : i32
    %c0_i32_1 = arith.constant 0 : i32
    return %c0_i32, %c0_i32_0 : i32, i32
  }
  func.func @transform_1(%arg0: i32) -> (i32, i32) {
    %c0_i32 = arith.constant 0 : i32
    %c0_i32_0 = arith.constant 0 : i32
    %c0_i32_1 = arith.constant 0 : i32
    return %c0_i32, %c0_i32_0 : i32, i32
  }
  func.func @transform_2(%arg0: i32) -> (i32, i32) {
    %c0_i32 = arith.constant 0 : i32
    %c0_i32_0 = arith.constant 0 : i32
    %c0_i32_1 = arith.constant 0 : i32
    return %c0_i32, %c0_i32_0 : i32, i32
  }
  func.func @transform_3(%arg0: i32) -> (i32, i32) {
    %c0_i32 = arith.constant 0 : i32
    %c0_i32_0 = arith.constant 0 : i32
    %c0_i32_1 = arith.constant 0 : i32
    return %c0_i32, %c0_i32_0 : i32, i32
  }
  func.func @transform_4(%arg0: i32) -> (i32, i32) {
    %c0_i32 = arith.constant 0 : i32
    %c0_i32_0 = arith.constant 0 : i32
    %c0_i32_1 = arith.constant 0 : i32
    return %c0_i32, %c0_i32_0 : i32, i32
  }
}

module attributes {stable_mosaic.version = 11 : i64} {
  func.func @_gcn_kernel(%arg0: i32, %arg1: memref<40x384xf32, #tpu.memory_space<vmem>>, %arg2: memref<40x40xf32, #tpu.memory_space<vmem>>, %arg3: memref<384x128xf32, #tpu.memory_space<vmem>>, %arg4: memref<1x128xf32, #tpu.memory_space<vmem>>, %arg5: memref<40x128xf32, #tpu.memory_space<vmem>>) attributes {dimension_semantics = [#tpu.dimension_semantics<arbitrary>], iteration_bounds = array<i64: 1>, scalar_prefetch = 0 : i64, scratch_operands = 0 : i64, tpu.core_type = #tpu.core_type<tc>, window_params = [{pipeline_mode = #tpu.pipeline_mode<synchronous>, transform_indices = @transform_0, window_bounds = array<i64: 40, 384>}, {pipeline_mode = #tpu.pipeline_mode<synchronous>, transform_indices = @transform_1, window_bounds = array<i64: 40, 40>}, {pipeline_mode = #tpu.pipeline_mode<synchronous>, transform_indices = @transform_2, window_bounds = array<i64: 384, 128>}, {pipeline_mode = #tpu.pipeline_mode<synchronous>, transform_indices = @transform_3, window_bounds = array<i64: 1, 128>}, {pipeline_mode = #tpu.pipeline_mode<synchronous>, transform_indices = @transform_4, window_bounds = array<i64: 40, 128>}]} {
    %c0 = arith.constant 0 : index
    %c0_0 = arith.constant 0 : index
    %0 = vector.load %arg1[%c0, %c0_0] : memref<40x384xf32, #tpu.memory_space<vmem>>, vector<40x384xf32>
    %c0_1 = arith.constant 0 : index
    %c0_2 = arith.constant 0 : index
    %1 = vector.load %arg2[%c0_1, %c0_2] : memref<40x40xf32, #tpu.memory_space<vmem>>, vector<40x40xf32>
    %c0_3 = arith.constant 0 : index
    %c0_4 = arith.constant 0 : index
    %2 = vector.load %arg3[%c0_3, %c0_4] : memref<384x128xf32, #tpu.memory_space<vmem>>, vector<384x128xf32>
    %c0_5 = arith.constant 0 : index
    %c0_6 = arith.constant 0 : index
    %3 = vector.load %arg4[%c0_5, %c0_6] : memref<1x128xf32, #tpu.memory_space<vmem>>, vector<1x128xf32>
    %cst = arith.constant dense<0.000000e+00> : vector<40x128xf32>
    %4 = tpu.matmul %0, %2, %cst {dimension_numbers = #tpu.dot_dimension_numbers<[1], [0], [0], [1], [0, 0, 1, 1], [], []>} : vector<40x384xf32>, vector<384x128xf32>, vector<40x128xf32> -> vector<40x128xf32>
    %cst_7 = arith.constant dense<0.000000e+00> : vector<40xf32>
    %5 = vector.multi_reduction <add>, %1, %cst_7 [1] : vector<40x40xf32> to vector<40xf32>
    %6 = vector.shape_cast %5 : vector<40xf32> to vector<40x1xf32>
    %cst_8 = arith.constant 2.000000e+00 : f32
    %7 = vector.broadcast %cst_8 : f32 to vector<40x1xf32>
    %8 = arith.addf %6, %7 : vector<40x1xf32>
    %9 = math.rsqrt %8 : vector<40x1xf32>
    %10 = vector.broadcast %9 : vector<40x1xf32> to vector<40x128xf32>
    %11 = arith.mulf %4, %10 : vector<40x128xf32>
    %cst_9 = arith.constant dense<0.000000e+00> : vector<40x128xf32>
    %12 = tpu.matmul %1, %11, %cst_9 {dimension_numbers = #tpu.dot_dimension_numbers<[1], [0], [0], [1], [0, 0, 1, 1], [], []>} : vector<40x40xf32>, vector<40x128xf32>, vector<40x128xf32> -> vector<40x128xf32>
    %cst_10 = arith.constant 2.000000e+00 : f32
    %13 = vector.broadcast %cst_10 : f32 to vector<40x128xf32>
    %14 = arith.mulf %13, %11 : vector<40x128xf32>
    %15 = arith.addf %12, %14 : vector<40x128xf32>
    %16 = vector.broadcast %9 : vector<40x1xf32> to vector<40x128xf32>
    %17 = arith.mulf %15, %16 : vector<40x128xf32>
    %18 = vector.broadcast %3 : vector<1x128xf32> to vector<40x128xf32>
    %19 = arith.addf %17, %18 : vector<40x128xf32>
    %cst_11 = arith.constant 0.000000e+00 : f32
    %20 = vector.broadcast %cst_11 : f32 to vector<40x128xf32>
    %21 = arith.maximumf %19, %20 : vector<40x128xf32>
    %c0_12 = arith.constant 0 : index
    %c0_13 = arith.constant 0 : index
    %22 = vector.load %arg5[%c0_12, %c0_13] : memref<40x128xf32, #tpu.memory_space<vmem>>, vector<40x128xf32>
    tpu.vector_store %arg5[%c0_12, %c0_13], %21 {strides = array<i32>} : memref<40x128xf32, #tpu.memory_space<vmem>>, vector<40x128xf32>,
    return
  }
  func.func @transform_0(%arg0: i32) -> (i32, i32) {
    %c0_i32 = arith.constant 0 : i32
    %c0_i32_0 = arith.constant 0 : i32
    %c0_i32_1 = arith.constant 0 : i32
    return %c0_i32, %c0_i32_0 : i32, i32
  }
  func.func @transform_1(%arg0: i32) -> (i32, i32) {
    %c0_i32 = arith.constant 0 : i32
    %c0_i32_0 = arith.constant 0 : i32
    %c0_i32_1 = arith.constant 0 : i32
    return %c0_i32, %c0_i32_0 : i32, i32
  }
  func.func @transform_2(%arg0: i32) -> (i32, i32) {
    %c0_i32 = arith.constant 0 : i32
    %c0_i32_0 = arith.constant 0 : i32
    %c0_i32_1 = arith.constant 0 : i32
    return %c0_i32, %c0_i32_0 : i32, i32
  }
  func.func @transform_3(%arg0: i32) -> (i32, i32) {
    %c0_i32 = arith.constant 0 : i32
    %c0_i32_0 = arith.constant 0 : i32
    %c0_i32_1 = arith.constant 0 : i32
    return %c0_i32, %c0_i32_0 : i32, i32
  }
  func.func @transform_4(%arg0: i32) -> (i32, i32) {
    %c0_i32 = arith.constant 0 : i32
    %c0_i32_0 = arith.constant 0 : i32
    %c0_i32_1 = arith.constant 0 : i32
    return %c0_i32, %c0_i32_0 : i32, i32
  }
}

module attributes {stable_mosaic.version = 11 : i64} {
  func.func @_gcn_kernel(%arg0: i32, %arg1: memref<48x192xf32, #tpu.memory_space<vmem>>, %arg2: memref<48x48xf32, #tpu.memory_space<vmem>>, %arg3: memref<192x128xf32, #tpu.memory_space<vmem>>, %arg4: memref<1x128xf32, #tpu.memory_space<vmem>>, %arg5: memref<48x128xf32, #tpu.memory_space<vmem>>) attributes {dimension_semantics = [#tpu.dimension_semantics<arbitrary>], iteration_bounds = array<i64: 1>, scalar_prefetch = 0 : i64, scratch_operands = 0 : i64, tpu.core_type = #tpu.core_type<tc>, window_params = [{pipeline_mode = #tpu.pipeline_mode<synchronous>, transform_indices = @transform_0, window_bounds = array<i64: 48, 192>}, {pipeline_mode = #tpu.pipeline_mode<synchronous>, transform_indices = @transform_1, window_bounds = array<i64: 48, 48>}, {pipeline_mode = #tpu.pipeline_mode<synchronous>, transform_indices = @transform_2, window_bounds = array<i64: 192, 128>}, {pipeline_mode = #tpu.pipeline_mode<synchronous>, transform_indices = @transform_3, window_bounds = array<i64: 1, 128>}, {pipeline_mode = #tpu.pipeline_mode<synchronous>, transform_indices = @transform_4, window_bounds = array<i64: 48, 128>}]} {
    %c0 = arith.constant 0 : index
    %c0_0 = arith.constant 0 : index
    %0 = vector.load %arg1[%c0, %c0_0] : memref<48x192xf32, #tpu.memory_space<vmem>>, vector<48x192xf32>
    %c0_1 = arith.constant 0 : index
    %c0_2 = arith.constant 0 : index
    %1 = vector.load %arg2[%c0_1, %c0_2] : memref<48x48xf32, #tpu.memory_space<vmem>>, vector<48x48xf32>
    %c0_3 = arith.constant 0 : index
    %c0_4 = arith.constant 0 : index
    %2 = vector.load %arg3[%c0_3, %c0_4] : memref<192x128xf32, #tpu.memory_space<vmem>>, vector<192x128xf32>
    %c0_5 = arith.constant 0 : index
    %c0_6 = arith.constant 0 : index
    %3 = vector.load %arg4[%c0_5, %c0_6] : memref<1x128xf32, #tpu.memory_space<vmem>>, vector<1x128xf32>
    %cst = arith.constant dense<0.000000e+00> : vector<48x128xf32>
    %4 = tpu.matmul %0, %2, %cst {dimension_numbers = #tpu.dot_dimension_numbers<[1], [0], [0], [1], [0, 0, 1, 1], [], []>} : vector<48x192xf32>, vector<192x128xf32>, vector<48x128xf32> -> vector<48x128xf32>
    %cst_7 = arith.constant dense<0.000000e+00> : vector<48xf32>
    %5 = vector.multi_reduction <add>, %1, %cst_7 [1] : vector<48x48xf32> to vector<48xf32>
    %6 = vector.shape_cast %5 : vector<48xf32> to vector<48x1xf32>
    %cst_8 = arith.constant 2.000000e+00 : f32
    %7 = vector.broadcast %cst_8 : f32 to vector<48x1xf32>
    %8 = arith.addf %6, %7 : vector<48x1xf32>
    %9 = math.rsqrt %8 : vector<48x1xf32>
    %10 = vector.broadcast %9 : vector<48x1xf32> to vector<48x128xf32>
    %11 = arith.mulf %4, %10 : vector<48x128xf32>
    %cst_9 = arith.constant dense<0.000000e+00> : vector<48x128xf32>
    %12 = tpu.matmul %1, %11, %cst_9 {dimension_numbers = #tpu.dot_dimension_numbers<[1], [0], [0], [1], [0, 0, 1, 1], [], []>} : vector<48x48xf32>, vector<48x128xf32>, vector<48x128xf32> -> vector<48x128xf32>
    %cst_10 = arith.constant 2.000000e+00 : f32
    %13 = vector.broadcast %cst_10 : f32 to vector<48x128xf32>
    %14 = arith.mulf %13, %11 : vector<48x128xf32>
    %15 = arith.addf %12, %14 : vector<48x128xf32>
    %16 = vector.broadcast %9 : vector<48x1xf32> to vector<48x128xf32>
    %17 = arith.mulf %15, %16 : vector<48x128xf32>
    %18 = vector.broadcast %3 : vector<1x128xf32> to vector<48x128xf32>
    %19 = arith.addf %17, %18 : vector<48x128xf32>
    %20 = tpu.iota {dimensions = array<i32: 1>} : vector<48x128xi32>
    %c8_i32 = arith.constant 8 : i32
    %21 = vector.broadcast %c8_i32 : i32 to vector<48x128xi32>
    %22 = arith.cmpi slt, %20, %21 : vector<48x128xi32>
    %cst_11 = arith.constant 0xFF800000 : f32
    %23 = vector.broadcast %cst_11 : f32 to vector<48x128xf32>
    %24 = arith.select %22, %19, %23 : vector<48x128xi1>, vector<48x128xf32>
    %cst_12 = arith.constant dense<0xFF800000> : vector<48xf32>
    %25 = vector.multi_reduction <maximumf>, %24, %cst_12 [1] : vector<48x128xf32> to vector<48xf32>
    %26 = vector.shape_cast %25 : vector<48xf32> to vector<48x1xf32>
    %27 = vector.broadcast %26 : vector<48x1xf32> to vector<48x128xf32>
    %28 = arith.subf %24, %27 : vector<48x128xf32>
    %29 = math.exp %28 : vector<48x128xf32>
    %cst_13 = arith.constant dense<0.000000e+00> : vector<48xf32>
    %30 = vector.multi_reduction <add>, %29, %cst_13 [1] : vector<48x128xf32> to vector<48xf32>
    %31 = vector.shape_cast %30 : vector<48xf32> to vector<48x1xf32>
    %32 = math.log %31 : vector<48x1xf32>
    %33 = vector.broadcast %32 : vector<48x1xf32> to vector<48x128xf32>
    %34 = arith.subf %28, %33 : vector<48x128xf32>
    %c0_14 = arith.constant 0 : index
    %c0_15 = arith.constant 0 : index
    %35 = vector.load %arg5[%c0_14, %c0_15] : memref<48x128xf32, #tpu.memory_space<vmem>>, vector<48x128xf32>
    tpu.vector_store %arg5[%c0_14, %c0_15], %34 {strides = array<i32>} : memref<48x128xf32, #tpu.memory_space<vmem>>, vector<48x128xf32>,
    return
  }
  func.func @transform_0(%arg0: i32) -> (i32, i32) {
    %c0_i32 = arith.constant 0 : i32
    %c0_i32_0 = arith.constant 0 : i32
    %c0_i32_1 = arith.constant 0 : i32
    return %c0_i32, %c0_i32_0 : i32, i32
  }
  func.func @transform_1(%arg0: i32) -> (i32, i32) {
    %c0_i32 = arith.constant 0 : i32
    %c0_i32_0 = arith.constant 0 : i32
    %c0_i32_1 = arith.constant 0 : i32
    return %c0_i32, %c0_i32_0 : i32, i32
  }
  func.func @transform_2(%arg0: i32) -> (i32, i32) {
    %c0_i32 = arith.constant 0 : i32
    %c0_i32_0 = arith.constant 0 : i32
    %c0_i32_1 = arith.constant 0 : i32
    return %c0_i32, %c0_i32_0 : i32, i32
  }
  func.func @transform_3(%arg0: i32) -> (i32, i32) {
    %c0_i32 = arith.constant 0 : i32
    %c0_i32_0 = arith.constant 0 : i32
    %c0_i32_1 = arith.constant 0 : i32
    return %c0_i32, %c0_i32_0 : i32, i32
  }
  func.func @transform_4(%arg0: i32) -> (i32, i32) {
    %c0_i32 = arith.constant 0 : i32
    %c0_i32_0 = arith.constant 0 : i32
    %c0_i32_1 = arith.constant 0 : i32
    return %c0_i32, %c0_i32_0 : i32, i32
  }
}

</mosaic_0001>

<bundles_post_ra>
// kernel: gunet_seg_forward.7
= control target key start
LH: loop header
LB: loop body
LE: loop exit
PB: predicated region body
PF: predicated region fallthrough
CT: control target
= control target key end

     0   :  { %vm56_vm0 = vcmask 1040384   ;;  %vm37_vm1 = vcmask 72704   ;;  %vm155_vm2 = vcmask 392192   ;;  %vm335_vm3 = vcmask 523264   ;;  %s672_s2 = inlined_call_operand.vmem [shape: f32[9,64], index: 2, kind: input, shape index: {}]   ;;  %s673_s0 = inlined_call_operand.vmem [shape: f32[48,9], index: 0, kind: input, shape index: {}]   ;;  %s674_s1 = inlined_call_operand.vmem [shape: f32[48,48], index: 1, kind: input, shape index: {}]   ;;  %s675_s3 = inlined_call_operand.vmem [shape: f32[1,64], index: 3, kind: input, shape index: {}]   ;;  %s676_s4 = inlined_call_operand.vmem [shape: f32[1,64], index: 4, kind: input, shape index: {}]   ;;  %s677_s5 = inlined_call_operand.vmem [shape: f32[48,64], index: 5, kind: output, shape index: {0}]   ;;  %s678_s6 = inlined_call_operand.vmem [shape: f32[48,1], index: 6, kind: output, shape index: {1}]  }
   0x1   :  { %v35_v0 = vld [vmem:[%s672_s2 + $0x8] sm:$0x1]  ;;  %v34_v1 = vld [vmem:[%s672_s2] sm:$0xff]  ;;  %v24_v4 = vld [vmem:[%s673_s0 + $0x10] sm:$0xff]  ;;  %vm379_vm4 = vcmask 7168  }
   0x2   :  { %v22_v2 = vld [vmem:[%s673_s0] sm:$0xff]  ;;  %429 = vmatprep.subr.msk.mxu0 %vm56_vm0, %v35_v0  ;;  %v23_v3 = vld [vmem:[%s673_s0 + $0x8] sm:$0xff]  ;;  %v560_v7 = vld [vmem:[%s674_s1 + $0x18] sm:$0xff] }
   0x3   :  { %433 = vmatprep.mubr.msk.f32.mxu0 %vm37_vm1, %v22_v2  ;;  %430 = vmatpush3.msk.msra.mxu0 %vm56_vm0, %v35_v0  ;;  %v553_v5 = vld [vmem:[%s674_s1 + $0x28] sm:$0xff]  ;;  %v565_v8 = vld [vmem:[%s674_s1 + $0x20] sm:$0xff]  ;;  %v30_v9 = vld [vmem:[%s674_s1 + $0x10] sm:$0xff]  ;;  %v165_v10 = vsel %vm155_vm2, %v560_v7, 0.0 }
   0x4   :  { %431 = vmatprep.subr.mxu0 %v34_v1  ;;  %v171_v6 = vsel %vm155_vm2, %v553_v5, 0.0  ;;  %166 = vadd.xlane.f32.xlu1 %v165_v10  ;;  %v168_v11 = vsel %vm155_vm2, %v565_v8, 0.0  ;;  %v25_v12 = vld [vmem:[%s673_s0 + $0x18] sm:$0xff]  ;;  %v162_v13 = vsel %vm155_vm2, %v30_v9, 0.0  ;;  %v583_v14 = vld [vmem:[%s674_s1 + $0x8] sm:$0xff]  ;;  %v26_v15 = vld [vmem:[%s673_s0 + $0x20] sm:$0xff] }
   0x5   :  { %432 = vmatpush3.msra.mxu0 %v34_v1  ;;  %172 = vadd.xlane.f32.xlu0 %v171_v6  ;;  %v28_v16 = vld [vmem:[%s674_s1] sm:$0xff]  ;;  %v159_v17 = vsel %vm155_vm2, %v583_v14, 0.0  ;;  %v27_v18 = vld [vmem:[%s673_s0 + $0x28] sm:$0xff] }
   0x6   :  { %434 = vmatmul.mubr.msk.f32.vlgmr.msra.gmra.mxu0 %vm37_vm1, %v23_v3  ;;  %457 = vmatprep.mubr.msk.f32.mxu1 %vm155_vm2, %v30_v9  ;;  %v156_v19 = vsel %vm155_vm2, %v28_v16, 0.0  ;;  %v407_v58 = vld [vmem:[%s675_s3] ss:$0 sm:$0xff] }
   0x7   :  { %436 = vmatprep.mubr.msk.f32.mxu0 %vm37_vm1, %v24_v4  ;;  %v408_v10 = vld [vmem:[%s676_s4] ss:$0 sm:$0xff] }
   0x8   :  { %163 = vadd.xlane.f32.xlu1 %v162_v13 }
   0x9   :  { %169 = vadd.xlane.f32.xlu0 %v168_v11 }
   0xa   :  { %437 = vmatmul.mubr.msk.f32.gmra.mxu0 %vm37_vm1, %v25_v12 }
   0xb   :  { %439 = vmatprep.mubr.msk.f32.mxu0 %vm37_vm1, %v26_v15 }
   0xc   :  { %157 = vadd.xlane.f32.xlu1 %v156_v19 }
   0xd   :  { %160 = vadd.xlane.f32.xlu0 %v159_v17 }
   0xe   :  { %440 = vmatmul.mubr.msk.f32.gmra.mxu0 %vm37_vm1, %v27_v18 }
   0xf   :  { %454 = vmatprep.mubr.msk.f32.mxu0 %vm155_vm2, %v28_v16 }
  0x8d   :  { %v167_v21 = vpop.xlane.xlu1 %166 }
  0x8e   :  { %v173_v20 = vpop.xlane.xlu0 %172  ;;  %v177_v26 = vadd.f32 2.0, %v167_v21 }
  0x8f   :  { %v179_v23 = vadd.f32 2.0, %v173_v20 }
  0x91   :  { %v164_v24 = vpop.xlane.xlu1 %163  ;;  %475 = vrsqrt.f32 %v179_v23 }
  0x92   :  { %v170_v22 = vpop.xlane.xlu0 %169  ;;  %v176_v28 = vadd.f32 2.0, %v164_v24 }
  0x93   :  { %v178_v25 = vadd.f32 2.0, %v170_v22 }
  0x95   :  { %477 = vrsqrt.f32 %v178_v25  ;;  %v158_v29 = vpop.xlane.xlu1 %157 }
  0x96   :  { %v161_v27 = vpop.xlane.xlu0 %160  ;;  %479 = vrsqrt.f32 %v177_v26  ;;  %v174_v31 = vadd.f32 2.0, %v158_v29 }
  0x97   :  { %v175_v30 = vadd.f32 2.0, %v161_v27  ;;  %481 = vrsqrt.f32 %v176_v28 }
  0x99   :  { %483 = vrsqrt.f32 %v175_v30 }
  0x9a   :  { %485 = vrsqrt.f32 %v174_v31 }
  0x9e   :  { %v602_v36 = vpop.eup %475 }
  0xa2   :  { %v604_v37 = vpop.eup %477 }
  0xa3   :  { %v480_v40 = vpop.eup %479 }
  0xa4   :  { %v482_v43 = vpop.eup %481 }
  0xa6   :  { %v484_v45 = vpop.eup %483 }
  0xa7   :  { %v486_v47 = vpop.eup %485 }
  0xc6   :  { %v435_v32 = vpop.f32.mrf.mxu0 }
  0xc7   :  { %v187_v48 = vmul.f32 %v484_v45, %v435_v32 }
  0xc8   :  { %v126_v33 = vpop.f32.mrf.mxu0 }
  0xc9   :  { %v186_v49 = vmul.f32 %v486_v47, %v126_v33  ;;  %v193_v50 = vmul.f32 2.0, %v187_v48 }
  0xca   :  { %v438_v34 = vpop.f32.mrf.mxu0 }
  0xcb   :  { %v189_v44 = vmul.f32 %v480_v40, %v438_v34  ;;  %v192_v56 = vmul.f32 2.0, %v186_v49 }
  0xcc   :  { %v136_v35 = vpop.f32.mrf.mxu0 }
  0xcd   :  { %v188_v46 = vmul.f32 %v482_v43, %v136_v35  ;;  %v195_v51 = vmul.f32 2.0, %v189_v44 }
  0xce   :  { %v441_v38 = vpop.f32.mrf.mxu0 }
  0xcf   :  { %v191_v39 = vmul.f32 %v602_v36, %v441_v38  ;;  %v194_v57 = vmul.f32 2.0, %v188_v46 }
  0xd0   :  { %v146_v41 = vpop.f32.mrf.mxu0 }
  0xd1   :  { %v190_v42 = vmul.f32 %v604_v37, %v146_v41  ;;  %442 = vmatprep.subr.mxu0 %v191_v39  ;;  %463 = vmatprep.subr.mxu1 %v191_v39  ;;  %v197_v1 = vmul.f32 2.0, %v191_v39 }
  0xd2   :  { %443 = vmatpush3.msra.mxu0 %v191_v39  ;;  %469 = vmatpush3.msra.mxu1 %v191_v39 }
  0xd3   :  { %444 = vmatprep.subr.mxu0 %v190_v42  ;;  %464 = vmatprep.subr.mxu1 %v190_v42  ;;  %v196_v3 = vmul.f32 2.0, %v190_v42 }
  0xd4   :  { %445 = vmatpush3.msra.mxu0 %v190_v42  ;;  %470 = vmatpush3.msra.mxu1 %v190_v42 }
  0xd5   :  { %446 = vmatprep.subr.mxu0 %v189_v44  ;;  %465 = vmatprep.subr.mxu1 %v189_v44 }
  0xd6   :  { %447 = vmatpush3.msra.mxu0 %v189_v44  ;;  %471 = vmatpush3.msra.mxu1 %v189_v44 }
  0xd7   :  { %448 = vmatprep.subr.mxu0 %v188_v46  ;;  %466 = vmatprep.subr.mxu1 %v188_v46 }
  0xd8   :  { %449 = vmatpush3.msra.mxu0 %v188_v46  ;;  %472 = vmatpush3.msra.mxu1 %v188_v46 }
  0xd9   :  { %450 = vmatprep.subr.mxu0 %v187_v48  ;;  %467 = vmatprep.subr.mxu1 %v187_v48 }
  0xda   :  { %451 = vmatpush3.msra.mxu0 %v187_v48  ;;  %473 = vmatpush3.msra.mxu1 %v187_v48 }
  0xdb   :  { %452 = vmatprep.subr.mxu0 %v186_v49  ;;  %468 = vmatprep.subr.mxu1 %v186_v49 }
  0xdc   :  { %453 = vmatpush3.msra.mxu0 %v186_v49  ;;  %474 = vmatpush3.msra.mxu1 %v186_v49 }
  0xdd   :  { %455 = vmatmul.mubr.msk.f32.vlgmr.msra.gmra.mxu0 %vm155_vm2, %v583_v14  ;;  %458 = vmatmul.mubr.msk.f32.vlgmr.msra.gmra.mxu1 %vm155_vm2, %v560_v7 }
  0xde   :  { %460 = vmatprep.mubr.msk.f32.mxu1 %vm155_vm2, %v565_v8 }
  0xe1   :  { %461 = vmatmul.mubr.msk.f32.gmra.mxu1 %vm155_vm2, %v553_v5 }
 0x19d   :  { %v456_v52 = vpop.f32.mrf.mxu0  ;;  %v459_v53 = vpop.f32.mrf.mxu1 }
 0x19e   :  { %v288_v54 = vadd.f32 %v456_v52, %v193_v50  ;;  %v298_v55 = vadd.f32 %v459_v53, %v195_v51 }
 0x19f   :  { %v282_v59 = vpop.f32.mrf.mxu0  ;;  %v292_v60 = vpop.f32.mrf.mxu1 }
 0x1a0   :  { %v312_v61 = vmul.f32 %v484_v45, %v288_v54  ;;  %v314_v62 = vmul.f32 %v480_v40, %v298_v55  ;;  %v283_v63 = vadd.f32 %v282_v59, %v192_v56  ;;  %v293_v0 = vadd.f32 %v292_v60, %v194_v57 }
 0x1a1   :  { %v462_v2 = vpop.f32.mrf.mxu1 }
 0x1a2   :  { %v324_v4 = vadd.f32 %v407_v58, %v312_v61  ;;  %v326_v5 = vadd.f32 %v407_v58, %v314_v62  ;;  %v311_v6 = vmul.f32 %v486_v47, %v283_v63  ;;  %v313_v7 = vmul.f32 %v482_v43, %v293_v0 }
 0x1a3   :  { %v308_v8 = vadd.f32 %v462_v2, %v197_v1  ;;  %v302_v9 = vpop.f32.mrf.mxu1 }
 0x1a4   :  { %v323_v11 = vadd.f32 %v407_v58, %v311_v6  ;;  %v325_v12 = vadd.f32 %v407_v58, %v313_v7  ;;  %v303_v13 = vadd.f32 %v302_v9, %v196_v3  ;;  %v330_v14 = vmax.f32 %v324_v4, 0.0 }
 0x1a5   :  { %v316_v15 = vmul.f32 %v602_v36, %v308_v8  ;;  %v332_v16 = vmax.f32 %v326_v5, 0.0 }
 0x1a6   :  { %v315_v17 = vmul.f32 %v604_v37, %v303_v13  ;;  %v350_v18 = vmul.f32 %v408_v10, %v330_v14  ;;  %337 = vst.msk [vmem:[%s677_s5 + $0x8] sm:$0xff] %vm335_vm3, %v330_v14  ;;  %v329_v19 = vmax.f32 %v323_v11, 0.0  ;;  %v331_v20 = vmax.f32 %v325_v12, 0.0 }
 0x1a7   :  { %v328_v21 = vadd.f32 %v407_v58, %v316_v15  ;;  %339 = vst.msk [vmem:[%s677_s5 + $0x18] sm:$0xff] %vm335_vm3, %v332_v16  ;;  %v352_v25 = vmul.f32 %v408_v10, %v332_v16 }
 0x1a8   :  { %v327_v22 = vadd.f32 %v407_v58, %v315_v17  ;;  %v358_v23 = vsel %vm335_vm3, %v350_v18, 0.0  ;;  %v349_v24 = vmul.f32 %v408_v10, %v329_v19  ;;  %336 = vst.msk [vmem:[%s677_s5] sm:$0xff] %vm335_vm3, %v329_v19  ;;  %338 = vst.msk [vmem:[%s677_s5 + $0x10] sm:$0xff] %vm335_vm3, %v331_v20  ;;  %v351_v28 = vmul.f32 %v408_v10, %v331_v20 }
 0x1a9   :  { %359 = vadd.xlane.f32.xlu1 %v358_v23  ;;  %v334_v26 = vmax.f32 %v328_v21, 0.0  ;;  %v364_v30 = vsel %vm335_vm3, %v352_v25, 0.0 }
 0x1aa   :  { %v355_v27 = vsel %vm335_vm3, %v349_v24, 0.0  ;;  %v333_v29 = vmax.f32 %v327_v22, 0.0  ;;  %v361_v32 = vsel %vm335_vm3, %v351_v28, 0.0 }
 0x1ab   :  { %356 = vadd.xlane.f32.xlu0 %v355_v27  ;;  %341 = vst.msk [vmem:[%s677_s5 + $0x28] sm:$0xff] %vm335_vm3, %v334_v26  ;;  %v354_v31 = vmul.f32 %v408_v10, %v334_v26 }
 0x1ac   :  { %340 = vst.msk [vmem:[%s677_s5 + $0x20] sm:$0xff] %vm335_vm3, %v333_v29  ;;  %v353_v33 = vmul.f32 %v408_v10, %v333_v29 }
 0x1ad   :  { %365 = vadd.xlane.f32.xlu1 %v364_v30  ;;  %v370_v34 = vsel %vm335_vm3, %v354_v31, 0.0 }
 0x1ae   :  { %v367_v35 = vsel %vm335_vm3, %v353_v33, 0.0 }
 0x1af   :  { %362 = vadd.xlane.f32.xlu0 %v361_v32 }
 0x1b1   :  { %371 = vadd.xlane.f32.xlu1 %v370_v34 }
 0x1b3   :  { %368 = vadd.xlane.f32.xlu0 %v367_v35 }
 0x232   :  { %v360_v36 = vpop.xlane.xlu1 %359 }
 0x233   :  { %487 = vtanh.f32 %v360_v36 }
 0x234   :  { %v357_v37 = vpop.xlane.xlu0 %356 }
 0x235   :  { %489 = vtanh.f32 %v357_v37 }
 0x236   :  { %v366_v38 = vpop.xlane.xlu1 %365 }
 0x237   :  { %491 = vtanh.f32 %v366_v38 }
 0x238   :  { %v363_v39 = vpop.xlane.xlu0 %362 }
 0x239   :  { %493 = vtanh.f32 %v363_v39 }
 0x23a   :  { %v372_v40 = vpop.xlane.xlu1 %371 }
 0x23b   :  { %495 = vtanh.f32 %v372_v40 }
 0x23c   :  { %v369_v41 = vpop.xlane.xlu0 %368 }
 0x23d   :  { %497 = vtanh.f32 %v369_v41 }
 0x240   :  { %v488_v42 = vpop.eup %487 }
 0x241   :  { %381 = vst.msk [vmem:[%s678_s6 + $0x8] sm:$0xff] %vm379_vm4, %v488_v42 }
 0x242   :  { %v490_v43 = vpop.eup %489 }
 0x243   :  { %380 = vst.msk [vmem:[%s678_s6] sm:$0xff] %vm379_vm4, %v490_v43 }
 0x244   :  { %v492_v44 = vpop.eup %491 }
 0x245   :  { %383 = vst.msk [vmem:[%s678_s6 + $0x18] sm:$0xff] %vm379_vm4, %v492_v44 }
 0x246   :  { %v494_v45 = vpop.eup %493 }
 0x247   :  { %382 = vst.msk [vmem:[%s678_s6 + $0x10] sm:$0xff] %vm379_vm4, %v494_v45 }
 0x248   :  { %v496_v46 = vpop.eup %495 }
 0x249   :  { %385 = vst.msk [vmem:[%s678_s6 + $0x28] sm:$0xff] %vm379_vm4, %v496_v46 }
 0x24a   :  { %v498_v47 = vpop.eup %497 }
 0x24b   :  { %384 = vst.msk [vmem:[%s678_s6 + $0x20] sm:$0xff] %vm379_vm4, %v498_v47 }

// kernel: gunet_seg_forward.8
= control target key start
LH: loop header
LB: loop body
LE: loop exit
PB: predicated region body
PF: predicated region fallthrough
CT: control target
= control target key end

     0   :  { %v14_v0 = vlaneseq  ;;  %vm35_vm6 = vcmask 392192   ;;  %s326_s0 = inlined_call_operand.vmem [shape: f32[48,48], index: 0, kind: input, shape index: {}]   ;;  %s327_s1 = inlined_call_operand.vmem [shape: f32[48,48], index: 1, kind: output, shape index: {}]  }
   0x1   :  { %v13_v3 = vld [vmem:[%s326_s0 + $0x28] sm:$0xff]  ;;  %v12_v5 = vld [vmem:[%s326_s0 + $0x20] sm:$0xff]  ;;  %v11_v9 = vld [vmem:[%s326_s0 + $0x18] sm:$0xff] }
   0x2   :  { %v226_v1 = vshrl.u32 %v14_v0, 7  ;;  %v228_v2 = vand.u32 127, %v14_v0  ;;  %v10_v13 = vld [vmem:[%s326_s0 + $0x10] sm:$0xff]  ;;  %v9_v15 = vld [vmem:[%s326_s0 + $0x8] sm:$0xff]  ;;  %v8_v17 = vld [vmem:[%s326_s0] sm:$0xff] }
   0x4   :  { %v234_v4 = vadd.s32 40, %v226_v1  ;;  %v240_v6 = vadd.s32 32, %v226_v1  ;;  %v18_v7 = vadd.s32 24, %v226_v1  ;;  %v17_v8 = vadd.s32 16, %v226_v1 }
   0x5   :  { %v16_v10 = vadd.s32 8, %v226_v1  ;;  %vm23_vm5 = vcmp.eq.s32.totalorder %v226_v1, %v228_v2 }
   0x6   :  { %vm28_vm0 = vcmp.eq.s32.totalorder %v234_v4, %v228_v2  ;;  %vm27_vm1 = vcmp.eq.s32.totalorder %v240_v6, %v228_v2  ;;  %vm26_vm2 = vcmp.eq.s32.totalorder %v18_v7, %v228_v2  ;;  %vm25_vm3 = vcmp.eq.s32.totalorder %v17_v8, %v228_v2 }
   0x7   :  { %v34_v11 = vsel %vm28_vm0, 1.0, %v13_v3  ;;  %v33_v12 = vsel %vm27_vm1, 1.0, %v12_v5  ;;  %v32_v14 = vsel %vm26_vm2, 1.0, %v11_v9  ;;  %vm24_vm4 = vcmp.eq.s32.totalorder %v16_v10, %v228_v2 }
   0x8   :  { %204 = vmatprep.subr.mxu1 %v34_v11  ;;  %183 = vmatprep.subr.mxu0 %v34_v11  ;;  %v31_v16 = vsel %vm25_vm3, 1.0, %v10_v13  ;;  %v30_v18 = vsel %vm24_vm4, 1.0, %v9_v15  ;;  %v29_v19 = vsel %vm23_vm5, 1.0, %v8_v17 }
   0x9   :  { %210 = vmatpush3.msra.mxu1 %v34_v11  ;;  %184 = vmatpush3.msra.mxu0 %v34_v11 }
   0xa   :  { %205 = vmatprep.subr.mxu1 %v33_v12  ;;  %185 = vmatprep.subr.mxu0 %v33_v12 }
   0xb   :  { %211 = vmatpush3.msra.mxu1 %v33_v12  ;;  %186 = vmatpush3.msra.mxu0 %v33_v12 }
   0xc   :  { %206 = vmatprep.subr.mxu1 %v32_v14  ;;  %187 = vmatprep.subr.mxu0 %v32_v14 }
   0xd   :  { %212 = vmatpush3.msra.mxu1 %v32_v14  ;;  %188 = vmatpush3.msra.mxu0 %v32_v14 }
   0xe   :  { %207 = vmatprep.subr.mxu1 %v31_v16  ;;  %189 = vmatprep.subr.mxu0 %v31_v16 }
   0xf   :  { %213 = vmatpush3.msra.mxu1 %v31_v16  ;;  %190 = vmatpush3.msra.mxu0 %v31_v16 }
  0x10   :  { %208 = vmatprep.subr.mxu1 %v30_v18  ;;  %191 = vmatprep.subr.mxu0 %v30_v18 }
  0x11   :  { %214 = vmatpush3.msra.mxu1 %v30_v18  ;;  %192 = vmatpush3.msra.mxu0 %v30_v18 }
  0x12   :  { %209 = vmatprep.subr.mxu1 %v29_v19  ;;  %198 = vmatprep.mubr.msk.f32.mxu1 %vm35_vm6, %v31_v16 }
  0x13   :  { %215 = vmatpush3.msra.mxu1 %v29_v19  ;;  %193 = vmatprep.subr.mxu0 %v29_v19 }
  0x14   :  { %199 = vmatmul.mubr.msk.f32.vlgmr.msra.gmra.mxu1 %vm35_vm6, %v32_v14  ;;  %194 = vmatpush3.msra.mxu0 %v29_v19 }
  0x15   :  { %195 = vmatprep.mubr.msk.f32.mxu0 %vm35_vm6, %v29_v19  ;;  %201 = vmatprep.mubr.msk.f32.mxu1 %vm35_vm6, %v33_v12 }
  0x16   :  { %196 = vmatmul.mubr.msk.f32.vlgmr.msra.gmra.mxu0 %vm35_vm6, %v30_v18 }
  0x18   :  { %202 = vmatmul.mubr.msk.f32.gmra.mxu1 %vm35_vm6, %v34_v11 }
  0xd4   :  { %v200_v20 = vpop.f32.mrf.mxu1 }
  0xd5   :  { %v152_v21 = vsel %vm26_vm2, 0.0, %v200_v20 }
  0xd6   :  { %158 = vst.msk [vmem:[%s327_s1 + $0x18] sm:$0xff] %vm35_vm6, %v152_v21  ;;  %v197_v22 = vpop.f32.mrf.mxu0  ;;  %v130_v23 = vpop.f32.mrf.mxu1 }
  0xd7   :  { %v150_v24 = vsel %vm24_vm4, 0.0, %v197_v22  ;;  %v151_v25 = vsel %vm25_vm3, 0.0, %v130_v23 }
  0xd8   :  { %156 = vst.msk [vmem:[%s327_s1 + $0x8] sm:$0xff] %vm35_vm6, %v150_v24  ;;  %157 = vst.msk [vmem:[%s327_s1 + $0x10] sm:$0xff] %vm35_vm6, %v151_v25  ;;  %v120_v26 = vpop.f32.mrf.mxu0  ;;  %v203_v27 = vpop.f32.mrf.mxu1 }
  0xd9   :  { %v149_v28 = vsel %vm23_vm5, 0.0, %v120_v26  ;;  %v154_v29 = vsel %vm28_vm0, 0.0, %v203_v27 }
  0xda   :  { %155 = vst.msk [vmem:[%s327_s1] sm:$0xff] %vm35_vm6, %v149_v28  ;;  %160 = vst.msk [vmem:[%s327_s1 + $0x28] sm:$0xff] %vm35_vm6, %v154_v29  ;;  %v140_v30 = vpop.f32.mrf.mxu1 }
  0xdb   :  { %v153_v31 = vsel %vm27_vm1, 0.0, %v140_v30 }
  0xdc   :  { %159 = vst.msk [vmem:[%s327_s1 + $0x20] sm:$0xff] %vm35_vm6, %v153_v31 }

// kernel: gunet_seg_forward.9
= control target key start
LH: loop header
LB: loop body
LE: loop exit
PB: predicated region body
PF: predicated region fallthrough
CT: control target
= control target key end

     0   :  { %v468_v0 = vmov 0.0   ;;  %vm469_vm0 = vmmov 0   ;;  %vm147_vm1 = vcmask 326656   ;;  %vm41_vm2 = vcmask 523264   ;;  %s671_s2 = inlined_call_operand.vmem [shape: f32[64,128], index: 2, kind: input, shape index: {}]   ;;  %s672_s1 = inlined_call_operand.vmem [shape: f32[40,40], index: 1, kind: input, shape index: {}]   ;;  %s673_s0 = inlined_call_operand.vmem [shape: f32[40,64], index: 0, kind: input, shape index: {}]   ;;  %s674_s3 = inlined_call_operand.vmem [shape: f32[1,128], index: 3, kind: input, shape index: {}]   ;;  %s675_s4 = inlined_call_operand.vmem [shape: f32[1,128], index: 4, kind: input, shape index: {}]   ;;  %s676_s5 = inlined_call_operand.vmem [shape: f32[40,128], index: 5, kind: output, shape index: {0}]   ;;  %s677_s6 = inlined_call_operand.vmem [shape: f32[40,1], index: 6, kind: output, shape index: {1}]  }
   0x1   :  { %390 = vmatprep.subr.mxu0 %v468_v0  ;;  %v39_v1 = vld [vmem:[%s671_s2 + $0x38] sm:$0xff]  ;;  %v38_v2 = vld [vmem:[%s671_s2 + $0x30] sm:$0xff]  ;;  %406 = vmatprep.mubr.msk.f32.mxu0 %vm469_vm0, %v468_v0  ;;  %v37_v3 = vld [vmem:[%s671_s2 + $0x28] sm:$0xff]  ;;  %vm341_vm3 = vcmask 7168  }
   0x2   :  { %391 = vmatpush3.msra.mxu0 %v39_v1  ;;  %421 = vmatprep.subr.mxu1 %v468_v0  ;;  %v36_v4 = vld [vmem:[%s671_s2 + $0x20] sm:$0xff]  ;;  %v533_v6 = vld [vmem:[%s672_s1 + $0x18] sm:$0xff]  ;;  %v540_v8 = vld [vmem:[%s672_s1 + $0x10] sm:$0xff] }
   0x3   :  { %392 = vmatprep.subr.mxu0 %v468_v0  ;;  %431 = vmatprep.mubr.msk.f32.mxu1 %vm469_vm0, %v468_v0  ;;  %v528_v5 = vld [vmem:[%s672_s1 + $0x20] sm:$0xff]  ;;  %v545_v9 = vld [vmem:[%s672_s1 + $0x8] sm:$0xff]  ;;  %v35_v10 = vld [vmem:[%s671_s2 + $0x18] sm:$0xff]  ;;  %v154_v11 = vsel %vm147_vm1, %v540_v8, 0.0  ;;  %v157_v12 = vsel %vm147_vm1, %v533_v6, 0.0 }
   0x4   :  { %393 = vmatpush3.msra.mxu0 %v38_v2  ;;  %v160_v7 = vsel %vm147_vm1, %v528_v5, 0.0  ;;  %155 = vadd.xlane.f32.xlu1 %v154_v11  ;;  %v34_v13 = vld [vmem:[%s671_s2 + $0x10] sm:$0xff]  ;;  %v562_v14 = vld [vmem:[%s672_s1] sm:$0xff]  ;;  %v151_v15 = vsel %vm147_vm1, %v545_v9, 0.0  ;;  %v33_v16 = vld [vmem:[%s671_s2 + $0x8] sm:$0xff] }
   0x5   :  { %394 = vmatprep.subr.mxu0 %v468_v0  ;;  %161 = vadd.xlane.f32.xlu0 %v160_v7  ;;  %v148_v17 = vsel %vm147_vm1, %v562_v14, 0.0  ;;  %v32_v18 = vld [vmem:[%s671_s2] sm:$0xff]  ;;  %v23_v20 = vld [vmem:[%s673_s0 + $0x8] sm:$0xff]  ;;  %v24_v21 = vld [vmem:[%s673_s0 + $0x10] sm:$0xff] }
   0x6   :  { %395 = vmatpush3.msra.mxu0 %v37_v3  ;;  %v22_v19 = vld [vmem:[%s673_s0] sm:$0xff]  ;;  %v25_v22 = vld [vmem:[%s673_s0 + $0x18] sm:$0xff] }
   0x7   :  { %396 = vmatprep.subr.mxu0 %v468_v0  ;;  %v26_v23 = vld [vmem:[%s673_s0 + $0x20] sm:$0xff] }
   0x8   :  { %397 = vmatpush3.msra.mxu0 %v36_v4  ;;  %152 = vadd.xlane.f32.xlu1 %v151_v15  ;;  %v365_v58 = vld [vmem:[%s674_s3] ss:$0 sm:$0xff] }
   0x9   :  { %398 = vmatprep.subr.mxu0 %v468_v0  ;;  %158 = vadd.xlane.f32.xlu0 %v157_v12 }
   0xa   :  { %399 = vmatpush3.msra.mxu0 %v35_v10 }
   0xb   :  { %400 = vmatprep.subr.mxu0 %v468_v0 }
   0xc   :  { %401 = vmatpush3.msra.mxu0 %v34_v13 }
   0xd   :  { %402 = vmatprep.subr.mxu0 %v468_v0  ;;  %149 = vadd.xlane.f32.xlu0 %v148_v17 }
   0xe   :  { %403 = vmatpush3.msra.mxu0 %v33_v16 }
   0xf   :  { %404 = vmatprep.subr.mxu0 %v468_v0 }
  0x10   :  { %405 = vmatpush3.msra.mxu0 %v32_v18 }
  0x11   :  { %407 = vmatmul.mubr.msk.f32.vlgmr.msra.gmra.mxu0 %vm41_vm2, %v22_v19 }
  0x12   :  { %409 = vmatprep.mubr.msk.f32.mxu0 %vm469_vm0, %v468_v0 }
  0x15   :  { %410 = vmatmul.mubr.msk.f32.gmra.mxu0 %vm41_vm2, %v23_v20 }
  0x16   :  { %412 = vmatprep.mubr.msk.f32.mxu0 %vm469_vm0, %v468_v0 }
  0x19   :  { %413 = vmatmul.mubr.msk.f32.gmra.mxu0 %vm41_vm2, %v24_v21 }
  0x1a   :  { %415 = vmatprep.mubr.msk.f32.mxu0 %vm469_vm0, %v468_v0 }
  0x1d   :  { %416 = vmatmul.mubr.msk.f32.gmra.mxu0 %vm41_vm2, %v25_v22 }
  0x1e   :  { %418 = vmatprep.mubr.msk.f32.mxu0 %vm469_vm0, %v468_v0 }
  0x21   :  { %419 = vmatmul.mubr.msk.f32.gmra.mxu0 %vm41_vm2, %v26_v23 }
  0x8d   :  { %v156_v25 = vpop.xlane.xlu1 %155 }
  0x8e   :  { %v162_v24 = vpop.xlane.xlu0 %161  ;;  %v165_v31 = vadd.f32 2.0, %v156_v25 }
  0x8f   :  { %v167_v27 = vadd.f32 2.0, %v162_v24 }
  0x91   :  { %v153_v29 = vpop.xlane.xlu1 %152  ;;  %448 = vrsqrt.f32 %v167_v27 }
  0x92   :  { %v159_v26 = vpop.xlane.xlu0 %158  ;;  %v164_v34 = vadd.f32 2.0, %v153_v29 }
  0x93   :  { %v166_v28 = vadd.f32 2.0, %v159_v26 }
  0x95   :  { %450 = vrsqrt.f32 %v166_v28 }
  0x96   :  { %v150_v32 = vpop.xlane.xlu0 %149  ;;  %452 = vrsqrt.f32 %v165_v31 }
  0x97   :  { %v163_v36 = vadd.f32 2.0, %v150_v32  ;;  %454 = vrsqrt.f32 %v164_v34 }
  0x99   :  { %456 = vrsqrt.f32 %v163_v36 }
  0x9e   :  { %v605_v42 = vpop.eup %448 }
  0xa2   :  { %v607_v43 = vpop.eup %450 }
  0xa3   :  { %v453_v46 = vpop.eup %452 }
  0xa4   :  { %v455_v49 = vpop.eup %454 }
  0xa6   :  { %v457_v51 = vpop.eup %456 }
  0xd1   :  { %v123_v30 = vpop.f32.mrf.mxu0 }
  0xd2   :  { %v173_v53 = vmul.f32 %v457_v51, %v123_v30 }
  0xd3   :  { %v408_v33 = vpop.f32.mrf.mxu0 }
  0xd4   :  { %v178_v54 = vmul.f32 2.0, %v173_v53 }
  0xd5   :  { %v128_v35 = vpop.f32.mrf.mxu0 }
  0xd6   :  { %v174_v52 = vmul.f32 %v455_v49, %v128_v35 }
  0xd7   :  { %v411_v37 = vpop.f32.mrf.mxu0 }
  0xd8   :  { %v179_v60 = vmul.f32 2.0, %v174_v52 }
  0xd9   :  { %v133_v38 = vpop.f32.mrf.mxu0 }
  0xda   :  { %v175_v50 = vmul.f32 %v453_v46, %v133_v38 }
  0xdb   :  { %v414_v39 = vpop.f32.mrf.mxu0 }
  0xdc   :  { %v180_v3 = vmul.f32 2.0, %v175_v50 }
  0xdd   :  { %v138_v40 = vpop.f32.mrf.mxu0 }
  0xde   :  { %v176_v48 = vmul.f32 %v607_v43, %v138_v40 }
  0xdf   :  { %v417_v41 = vpop.f32.mrf.mxu0 }
  0xe0   :  { %v181_v11 = vmul.f32 2.0, %v176_v48 }
  0xe1   :  { %v143_v44 = vpop.f32.mrf.mxu0 }
  0xe2   :  { %v177_v45 = vmul.f32 %v605_v42, %v143_v44 }
  0xe3   :  { %v420_v47 = vpop.f32.mrf.mxu0 }
  0xe4   :  { %422 = vmatpush3.msra.mxu1 %v177_v45  ;;  %v182_v19 = vmul.f32 2.0, %v177_v45 }
  0xe5   :  { %423 = vmatprep.subr.mxu1 %v468_v0 }
  0xe6   :  { %424 = vmatpush3.msra.mxu1 %v176_v48 }
  0xe7   :  { %425 = vmatprep.subr.mxu1 %v468_v0 }
  0xe8   :  { %426 = vmatpush3.msra.mxu1 %v175_v50 }
  0xe9   :  { %427 = vmatprep.subr.mxu1 %v468_v0 }
  0xea   :  { %428 = vmatpush3.msra.mxu1 %v174_v52 }
  0xeb   :  { %429 = vmatprep.subr.mxu1 %v468_v0 }
  0xec   :  { %430 = vmatpush3.msra.mxu1 %v173_v53 }
  0xed   :  { %432 = vmatmul.mubr.msk.f32.vlgmr.msra.gmra.mxu1 %vm147_vm1, %v562_v14 }
  0xee   :  { %434 = vmatprep.mubr.msk.f32.mxu1 %vm469_vm0, %v468_v0 }
  0xf1   :  { %435 = vmatmul.mubr.msk.f32.gmra.mxu1 %vm147_vm1, %v545_v9 }
  0xf2   :  { %437 = vmatprep.mubr.msk.f32.mxu1 %vm469_vm0, %v468_v0 }
  0xf5   :  { %438 = vmatmul.mubr.msk.f32.gmra.mxu1 %vm147_vm1, %v540_v8 }
  0xf6   :  { %440 = vmatprep.mubr.msk.f32.mxu1 %vm469_vm0, %v468_v0 }
  0xf9   :  { %441 = vmatmul.mubr.msk.f32.gmra.mxu1 %vm147_vm1, %v533_v6 }
  0xfa   :  { %443 = vmatprep.mubr.msk.f32.mxu1 %vm469_vm0, %v468_v0  ;;  %v366_v0 = vld [vmem:[%s675_s4] ss:$0 sm:$0xff] }
  0xfd   :  { %444 = vmatmul.mubr.msk.f32.gmra.mxu1 %vm147_vm1, %v528_v5 }
 0x1ad   :  { %v264_v55 = vpop.f32.mrf.mxu1 }
 0x1ae   :  { %v265_v56 = vadd.f32 %v264_v55, %v178_v54 }
 0x1af   :  { %v433_v57 = vpop.f32.mrf.mxu1 }
 0x1b0   :  { %v288_v59 = vmul.f32 %v457_v51, %v265_v56 }
 0x1b1   :  { %v269_v61 = vpop.f32.mrf.mxu1 }
 0x1b2   :  { %v270_v62 = vadd.f32 %v269_v61, %v179_v60  ;;  %v299_v63 = vadd.f32 %v365_v58, %v288_v59 }
 0x1b3   :  { %v436_v1 = vpop.f32.mrf.mxu1 }
 0x1b4   :  { %v289_v2 = vmul.f32 %v455_v49, %v270_v62  ;;  %v304_v4 = vmax.f32 %v299_v63, 0.0 }
 0x1b5   :  { %v274_v5 = vpop.f32.mrf.mxu1 }
 0x1b6   :  { %v275_v6 = vadd.f32 %v274_v5, %v180_v3  ;;  %v321_v7 = vmul.f32 %v366_v0, %v304_v4  ;;  %309 = vst [vmem:[%s676_s5] sm:$0xff] %v304_v4  ;;  %v300_v8 = vadd.f32 %v365_v58, %v289_v2 }
 0x1b7   :  { %v439_v9 = vpop.f32.mrf.mxu1 }
 0x1b8   :  { %v290_v10 = vmul.f32 %v453_v46, %v275_v6  ;;  %326 = vadd.xlane.f32.xlu1 %v321_v7  ;;  %v305_v12 = vmax.f32 %v300_v8, 0.0 }
 0x1b9   :  { %v279_v13 = vpop.f32.mrf.mxu1 }
 0x1ba   :  { %v280_v14 = vadd.f32 %v279_v13, %v181_v11  ;;  %v322_v15 = vmul.f32 %v366_v0, %v305_v12  ;;  %310 = vst [vmem:[%s676_s5 + $0x8] sm:$0xff] %v305_v12  ;;  %v301_v16 = vadd.f32 %v365_v58, %v290_v10 }
 0x1bb   :  { %v442_v17 = vpop.f32.mrf.mxu1 }
 0x1bc   :  { %v291_v18 = vmul.f32 %v607_v43, %v280_v14  ;;  %328 = vadd.xlane.f32.xlu0 %v322_v15  ;;  %v306_v20 = vmax.f32 %v301_v16, 0.0 }
 0x1bd   :  { %v284_v21 = vpop.f32.mrf.mxu1 }
 0x1be   :  { %v285_v22 = vadd.f32 %v284_v21, %v182_v19  ;;  %v323_v23 = vmul.f32 %v366_v0, %v306_v20  ;;  %311 = vst [vmem:[%s676_s5 + $0x10] sm:$0xff] %v306_v20  ;;  %v302_v24 = vadd.f32 %v365_v58, %v291_v18 }
 0x1bf   :  { %v445_v25 = vpop.f32.mrf.mxu1 }
 0x1c0   :  { %v292_v26 = vmul.f32 %v605_v42, %v285_v22  ;;  %330 = vadd.xlane.f32.xlu1 %v323_v23  ;;  %v307_v27 = vmax.f32 %v302_v24, 0.0 }
 0x1c2   :  { %v324_v28 = vmul.f32 %v366_v0, %v307_v27  ;;  %312 = vst [vmem:[%s676_s5 + $0x18] sm:$0xff] %v307_v27  ;;  %v303_v29 = vadd.f32 %v365_v58, %v292_v26 }
 0x1c4   :  { %332 = vadd.xlane.f32.xlu0 %v324_v28  ;;  %v308_v30 = vmax.f32 %v303_v29, 0.0 }
 0x1c6   :  { %v325_v31 = vmul.f32 %v366_v0, %v308_v30  ;;  %313 = vst [vmem:[%s676_s5 + $0x20] sm:$0xff] %v308_v30 }
 0x1c8   :  { %334 = vadd.xlane.f32.xlu1 %v325_v31 }
 0x241   :  { %v327_v32 = vpop.xlane.xlu1 %326 }
 0x242   :  { %458 = vtanh.f32 %v327_v32 }
 0x245   :  { %v329_v33 = vpop.xlane.xlu0 %328 }
 0x246   :  { %460 = vtanh.f32 %v329_v33 }
 0x249   :  { %v331_v34 = vpop.xlane.xlu1 %330 }
 0x24a   :  { %462 = vtanh.f32 %v331_v34 }
 0x24d   :  { %v333_v35 = vpop.xlane.xlu0 %332 }
 0x24e   :  { %464 = vtanh.f32 %v333_v35 }
 0x24f   :  { %v459_v36 = vpop.eup %458 }
 0x250   :  { %342 = vst.msk [vmem:[%s677_s6] sm:$0xff] %vm341_vm3, %v459_v36 }
 0x251   :  { %v335_v37 = vpop.xlane.xlu1 %334 }
 0x252   :  { %466 = vtanh.f32 %v335_v37 }
 0x253   :  { %v461_v38 = vpop.eup %460 }
 0x254   :  { %343 = vst.msk [vmem:[%s677_s6 + $0x8] sm:$0xff] %vm341_vm3, %v461_v38 }
 0x257   :  { %v463_v39 = vpop.eup %462 }
 0x258   :  { %344 = vst.msk [vmem:[%s677_s6 + $0x10] sm:$0xff] %vm341_vm3, %v463_v39 }
 0x25b   :  { %v465_v40 = vpop.eup %464 }
 0x25c   :  { %345 = vst.msk [vmem:[%s677_s6 + $0x18] sm:$0xff] %vm341_vm3, %v465_v40 }
 0x25f   :  { %v467_v41 = vpop.eup %466 }
 0x260   :  { %346 = vst.msk [vmem:[%s677_s6 + $0x20] sm:$0xff] %vm341_vm3, %v467_v41 }

// kernel: gunet_seg_forward.10
= control target key start
LH: loop header
LB: loop body
LE: loop exit
PB: predicated region body
PF: predicated region fallthrough
CT: control target
= control target key end

     0   :  { %v13_v0 = vlaneseq  ;;  %v203_v1 = vmov 0.0   ;;  %vm204_vm0 = vmmov 0   ;;  %vm31_vm6 = vcmask 326656   ;;  %s287_s0 = inlined_call_operand.vmem [shape: f32[40,40], index: 0, kind: input, shape index: {}]   ;;  %s288_s1 = inlined_call_operand.vmem [shape: f32[40,40], index: 1, kind: output, shape index: {}]  }
   0x1   :  { %166 = vmatprep.subr.mxu0 %v203_v1  ;;  %191 = vmatprep.subr.mxu1 %v203_v1  ;;  %v12_v4 = vld [vmem:[%s287_s0 + $0x20] sm:$0xff]  ;;  %v11_v6 = vld [vmem:[%s287_s0 + $0x18] sm:$0xff]  ;;  %v10_v10 = vld [vmem:[%s287_s0 + $0x10] sm:$0xff] }
   0x2   :  { %v14_v2 = vshrl.u32 %v13_v0, 7  ;;  %v215_v3 = vand.u32 127, %v13_v0  ;;  %176 = vmatprep.mubr.msk.f32.mxu0 %vm204_vm0, %v203_v1  ;;  %185 = vmatprep.mubr.msk.f32.mxu1 %vm204_vm0, %v203_v1  ;;  %v9_v13 = vld [vmem:[%s287_s0 + $0x8] sm:$0xff]  ;;  %v8_v15 = vld [vmem:[%s287_s0] sm:$0xff] }
   0x4   :  { %v18_v5 = vadd.s32 32, %v14_v2  ;;  %v17_v7 = vadd.s32 24, %v14_v2  ;;  %v16_v8 = vadd.s32 16, %v14_v2  ;;  %v15_v9 = vadd.s32 8, %v14_v2 }
   0x5   :  { %vm21_vm5 = vcmp.eq.s32.totalorder %v14_v2, %v215_v3 }
   0x6   :  { %vm25_vm1 = vcmp.eq.s32.totalorder %v18_v5, %v215_v3  ;;  %vm24_vm2 = vcmp.eq.s32.totalorder %v17_v7, %v215_v3  ;;  %vm23_vm3 = vcmp.eq.s32.totalorder %v16_v8, %v215_v3  ;;  %vm22_vm4 = vcmp.eq.s32.totalorder %v15_v9, %v215_v3 }
   0x7   :  { %v30_v11 = vsel %vm25_vm1, 1.0, %v12_v4  ;;  %v29_v12 = vsel %vm24_vm2, 1.0, %v11_v6  ;;  %v28_v14 = vsel %vm23_vm3, 1.0, %v10_v10  ;;  %v27_v16 = vsel %vm22_vm4, 1.0, %v9_v13 }
   0x8   :  { %167 = vmatpush3.msra.mxu0 %v30_v11  ;;  %196 = vmatpush3.msra.mxu1 %v30_v11  ;;  %v26_v17 = vsel %vm21_vm5, 1.0, %v8_v15 }
   0x9   :  { %168 = vmatprep.subr.mxu0 %v203_v1  ;;  %192 = vmatprep.subr.mxu1 %v203_v1 }
   0xa   :  { %169 = vmatpush3.msra.mxu0 %v29_v12  ;;  %197 = vmatpush3.msra.mxu1 %v29_v12 }
   0xb   :  { %170 = vmatprep.subr.mxu0 %v203_v1  ;;  %193 = vmatprep.subr.mxu1 %v203_v1 }
   0xc   :  { %171 = vmatpush3.msra.mxu0 %v28_v14  ;;  %198 = vmatpush3.msra.mxu1 %v28_v14 }
   0xd   :  { %172 = vmatprep.subr.mxu0 %v203_v1  ;;  %194 = vmatprep.subr.mxu1 %v203_v1 }
   0xe   :  { %173 = vmatpush3.msra.mxu0 %v27_v16  ;;  %199 = vmatpush3.msra.mxu1 %v27_v16 }
   0xf   :  { %174 = vmatprep.subr.mxu0 %v203_v1  ;;  %195 = vmatprep.subr.mxu1 %v203_v1 }
  0x10   :  { %175 = vmatpush3.msra.mxu0 %v26_v17  ;;  %200 = vmatpush3.msra.mxu1 %v26_v17 }
  0x11   :  { %177 = vmatmul.mubr.msk.f32.vlgmr.msra.gmra.mxu0 %vm31_vm6, %v26_v17  ;;  %186 = vmatmul.mubr.msk.f32.vlgmr.msra.gmra.mxu1 %vm31_vm6, %v29_v12 }
  0x12   :  { %179 = vmatprep.mubr.msk.f32.mxu0 %vm204_vm0, %v203_v1  ;;  %188 = vmatprep.mubr.msk.f32.mxu1 %vm204_vm0, %v203_v1 }
  0x15   :  { %180 = vmatmul.mubr.msk.f32.gmra.mxu0 %vm31_vm6, %v27_v16  ;;  %189 = vmatmul.mubr.msk.f32.gmra.mxu1 %vm31_vm6, %v30_v11 }
  0x16   :  { %182 = vmatprep.mubr.msk.f32.mxu0 %vm204_vm0, %v203_v1 }
  0x19   :  { %183 = vmatmul.mubr.msk.f32.gmra.mxu0 %vm31_vm6, %v28_v14 }
  0xd1   :  { %v113_v18 = vpop.f32.mrf.mxu0  ;;  %v128_v19 = vpop.f32.mrf.mxu1 }
  0xd2   :  { %v137_v20 = vsel %vm21_vm5, 0.0, %v113_v18  ;;  %v140_v21 = vsel %vm24_vm2, 0.0, %v128_v19 }
  0xd3   :  { %142 = vst.msk [vmem:[%s288_s1] sm:$0xff] %vm31_vm6, %v137_v20  ;;  %v178_v22 = vpop.f32.mrf.mxu0  ;;  %145 = vst.msk [vmem:[%s288_s1 + $0x18] sm:$0xff] %vm31_vm6, %v140_v21  ;;  %v187_v23 = vpop.f32.mrf.mxu1 }
  0xd5   :  { %v118_v24 = vpop.f32.mrf.mxu0  ;;  %v133_v25 = vpop.f32.mrf.mxu1 }
  0xd6   :  { %v138_v26 = vsel %vm22_vm4, 0.0, %v118_v24  ;;  %v141_v27 = vsel %vm25_vm1, 0.0, %v133_v25 }
  0xd7   :  { %143 = vst.msk [vmem:[%s288_s1 + $0x8] sm:$0xff] %vm31_vm6, %v138_v26  ;;  %v181_v28 = vpop.f32.mrf.mxu0  ;;  %146 = vst.msk [vmem:[%s288_s1 + $0x20] sm:$0xff] %vm31_vm6, %v141_v27  ;;  %v190_v29 = vpop.f32.mrf.mxu1 }
  0xd9   :  { %v123_v30 = vpop.f32.mrf.mxu0 }
  0xda   :  { %v139_v31 = vsel %vm23_vm3, 0.0, %v123_v30 }
  0xdb   :  { %144 = vst.msk [vmem:[%s288_s1 + $0x10] sm:$0xff] %vm31_vm6, %v139_v31  ;;  %v184_v32 = vpop.f32.mrf.mxu0 }

// kernel: gunet_seg_forward.11
= control target key start
LH: loop header
LB: loop body
LE: loop exit
PB: predicated region body
PF: predicated region fallthrough
CT: control target
= control target key end

     0   :  { %v345_v3 = vmov 0.0   ;;  %vm147_vm0 = vcmask 261120   ;;  %s566_s2 = inlined_call_operand.vmem [shape: f32[128,256], index: 2, kind: input, shape index: {}]   ;;  %s567_s1 = inlined_call_operand.vmem [shape: f32[32,32], index: 1, kind: input, shape index: {}]   ;;  %s568_s0 = inlined_call_operand.vmem [shape: f32[32,128], index: 0, kind: input, shape index: {}]   ;;  %s569_s3 = inlined_call_operand.vmem [shape: f32[1,256], index: 3, kind: input, shape index: {}]   ;;  %s570_s4 = inlined_call_operand.vmem [shape: f32[32,256], index: 4, kind: output, shape index: {}]  }
   0x1   :  { %v56_v0 = vld [vmem:[%s566_s2 + $0xf8] sm:$0xff]  ;;  %v55_v1 = vld [vmem:[%s566_s2 + $0xf0] sm:$0xff]  ;;  %v54_v2 = vld [vmem:[%s566_s2 + $0xe8] sm:$0xff]  ;;  %122 = vmatprep.mubr.f32.mxu0 %v345_v3  ;;  %260 = vmatprep.mubr.f32.mxu1 %v345_v3 }
   0x2   :  { %58 = vmatprep.subr.mxu0 %v56_v0  ;;  %v53_v4 = vld [vmem:[%s566_s2 + $0xe0] sm:$0xff]  ;;  %v52_v5 = vld [vmem:[%s566_s2 + $0xd8] sm:$0xff]  ;;  %v51_v6 = vld [vmem:[%s566_s2 + $0xd0] sm:$0xff] }
   0x3   :  { %59 = vmatpush1.msra.mxu0 %v55_v1  ;;  %v50_v7 = vld [vmem:[%s566_s2 + $0xc8] sm:$0xff]  ;;  %v49_v8 = vld [vmem:[%s566_s2 + $0xc0] sm:$0xff]  ;;  %v48_v9 = vld [vmem:[%s566_s2 + $0xb8] sm:$0xff] }
   0x4   :  { %60 = vmatprep.subr.mxu0 %v54_v2  ;;  %v47_v10 = vld [vmem:[%s566_s2 + $0xb0] sm:$0xff]  ;;  %v46_v11 = vld [vmem:[%s566_s2 + $0xa8] sm:$0xff]  ;;  %v45_v12 = vld [vmem:[%s566_s2 + $0xa0] sm:$0xff] }
   0x5   :  { %61 = vmatpush1.msra.mxu0 %v53_v4  ;;  %v44_v13 = vld [vmem:[%s566_s2 + $0x98] sm:$0xff]  ;;  %v43_v14 = vld [vmem:[%s566_s2 + $0x90] sm:$0xff]  ;;  %v42_v15 = vld [vmem:[%s566_s2 + $0x88] sm:$0xff] }
   0x6   :  { %62 = vmatprep.subr.mxu0 %v52_v5  ;;  %v421_v16 = vld [vmem:[%s567_s1 + $0x8] sm:$0xff]  ;;  %v426_v17 = vld [vmem:[%s567_s1] sm:$0xff]  ;;  %v431_v18 = vld [vmem:[%s567_s1 + $0x18] sm:$0xff] }
   0x7   :  { %63 = vmatpush1.msra.mxu0 %v51_v6  ;;  %v41_v19 = vld [vmem:[%s566_s2 + $0x80] sm:$0xff]  ;;  %v151_v20 = vsel %vm147_vm0, %v421_v16, 0.0  ;;  %v157_v21 = vsel %vm147_vm0, %v431_v18, 0.0  ;;  %v443_v22 = vld [vmem:[%s567_s1 + $0x10] sm:$0xff]  ;;  %v40_v23 = vld [vmem:[%s566_s2 + $0x78] sm:$0xff]  ;;  %v148_v25 = vsel %vm147_vm0, %v426_v17, 0.0 }
   0x8   :  { %64 = vmatprep.subr.mxu0 %v50_v7  ;;  %152 = vadd.xlane.f32.xlu1 %v151_v20  ;;  %v39_v24 = vld [vmem:[%s566_s2 + $0x70] sm:$0xff]  ;;  %v38_v26 = vld [vmem:[%s566_s2 + $0x68] sm:$0xff]  ;;  %v154_v27 = vsel %vm147_vm0, %v443_v22, 0.0  ;;  %v37_v28 = vld [vmem:[%s566_s2 + $0x60] sm:$0xff] }
   0x9   :  { %65 = vmatpush1.msra.mxu0 %v49_v8  ;;  %158 = vadd.xlane.f32.xlu0 %v157_v21  ;;  %v36_v29 = vld [vmem:[%s566_s2 + $0x58] sm:$0xff]  ;;  %v35_v30 = vld [vmem:[%s566_s2 + $0x50] sm:$0xff]  ;;  %v34_v31 = vld [vmem:[%s566_s2 + $0x48] sm:$0xff] }
   0xa   :  { %66 = vmatprep.subr.mxu0 %v48_v9  ;;  %v33_v32 = vld [vmem:[%s566_s2 + $0x40] sm:$0xff]  ;;  %v32_v33 = vld [vmem:[%s566_s2 + $0x38] sm:$0xff]  ;;  %v31_v34 = vld [vmem:[%s566_s2 + $0x30] sm:$0xff] }
   0xb   :  { %67 = vmatpush1.msra.mxu0 %v47_v10  ;;  %v30_v35 = vld [vmem:[%s566_s2 + $0x28] sm:$0xff]  ;;  %v29_v36 = vld [vmem:[%s566_s2 + $0x20] sm:$0xff]  ;;  %v28_v37 = vld [vmem:[%s566_s2 + $0x18] sm:$0xff]  ;;  %v294_v10 = vlaneseq }
   0xc   :  { %68 = vmatprep.subr.mxu0 %v46_v11  ;;  %149 = vadd.xlane.f32.xlu1 %v148_v25  ;;  %v27_v38 = vld [vmem:[%s566_s2 + $0x10] sm:$0xff]  ;;  %v26_v39 = vld [vmem:[%s566_s2 + $0x8] sm:$0xff]  ;;  %v25_v40 = vld [vmem:[%s566_s2] sm:$0xff] }
   0xd   :  { %69 = vmatpush1.msra.mxu0 %v45_v12  ;;  %155 = vadd.xlane.f32.xlu0 %v154_v27  ;;  %v17_v41 = vld [vmem:[%s568_s0] sm:$0xff]  ;;  %v18_v42 = vld [vmem:[%s568_s0 + $0x8] sm:$0xff]  ;;  %v19_v43 = vld [vmem:[%s568_s0 + $0x10] sm:$0xff]  ;;  %v295_v11 = vshrl.u32 %v294_v10, 7 }
   0xe   :  { %70 = vmatprep.subr.mxu0 %v44_v13  ;;  %v20_v44 = vld [vmem:[%s568_s0 + $0x18] sm:$0xff]  ;;  %v57_v13 = vld [vmem:[%s569_s3] sm:$0x3] }
   0xf   :  { %71 = vmatpush1.msra.mxu0 %v43_v14  ;;  %v296_v12 = vsub.s32 0, %v295_v11 }
  0x10   :  { %72 = vmatprep.subr.mxu0 %v42_v15  ;;  %v300_v15 = vsub.s32 1, %v295_v11 }
  0x11   :  { %73 = vmatpush1.msra.mxu0 %v41_v19  ;;  %v297_v19 = vrot.slane %v57_v13, %v296_v12 }
  0x12   :  { %74 = vmatprep.subr.mxu0 %v40_v23 }
  0x13   :  { %75 = vmatpush1.msra.mxu0 %v39_v24 }
  0x14   :  { %76 = vmatprep.subr.mxu0 %v38_v26 }
  0x15   :  { %77 = vmatpush1.msra.mxu0 %v37_v28 }
  0x16   :  { %78 = vmatprep.subr.mxu0 %v36_v29 }
  0x17   :  { %79 = vmatpush1.msra.mxu0 %v35_v30 }
  0x18   :  { %80 = vmatprep.subr.mxu0 %v34_v31 }
  0x19   :  { %81 = vmatpush1.msra.mxu0 %v33_v32 }
  0x1a   :  { %82 = vmatprep.subr.mxu0 %v32_v33 }
  0x1b   :  { %83 = vmatpush1.msra.mxu0 %v31_v34 }
  0x1c   :  { %84 = vmatprep.subr.mxu0 %v30_v35 }
  0x1d   :  { %85 = vmatpush1.msra.mxu0 %v29_v36 }
  0x1e   :  { %86 = vmatprep.subr.mxu0 %v28_v37 }
  0x1f   :  { %87 = vmatpush1.msra.mxu0 %v27_v38 }
  0x20   :  { %88 = vmatprep.subr.mxu0 %v26_v39 }
  0x21   :  { %89 = vmatpush1.msra.mxu0 %v25_v40 }
  0x22   :  { %123 = vmatmul.mubr.f32.vlgmr.msra.gmra.mxu0 %v17_v41 }
  0x23   :  { %128 = vmatprep.mubr.f32.mxu0 %v345_v3 }
  0x26   :  { %129 = vmatmul.mubr.f32.gmra.mxu0 %v18_v42 }
  0x27   :  { %134 = vmatprep.mubr.f32.mxu0 %v345_v3 }
  0x2a   :  { %135 = vmatmul.mubr.f32.gmra.mxu0 %v19_v43 }
  0x2b   :  { %140 = vmatprep.mubr.f32.mxu0 %v345_v3 }
  0x2e   :  { %141 = vmatmul.mubr.f32.gmra.mxu0 %v20_v44 }
  0x91   :  { %v153_v46 = vpop.xlane.xlu1 %152 }
  0x92   :  { %v159_v45 = vpop.xlane.xlu0 %158  ;;  %v161_v51 = vadd.f32 2.0, %v153_v46 }
  0x93   :  { %v163_v48 = vadd.f32 2.0, %v159_v45 }
  0x95   :  { %v150_v50 = vpop.xlane.xlu1 %149  ;;  %337 = vrsqrt.f32 %v163_v48 }
  0x96   :  { %v156_v47 = vpop.xlane.xlu0 %155  ;;  %v160_v53 = vadd.f32 2.0, %v150_v50 }
  0x97   :  { %v162_v49 = vadd.f32 2.0, %v156_v47 }
  0x99   :  { %339 = vrsqrt.f32 %v162_v49 }
  0x9a   :  { %341 = vrsqrt.f32 %v161_v51 }
  0x9b   :  { %343 = vrsqrt.f32 %v160_v53 }
  0xa2   :  { %v512_v60 = vpop.eup %337 }
  0xa6   :  { %v514_v62 = vpop.eup %339 }
  0xa7   :  { %v342_v1 = vpop.eup %341 }
  0xa8   :  { %v344_v5 = vpop.eup %343 }
  0xe2   :  { %v124_v52 = vpop.f32.mrf.mxu0 }
  0xe3   :  { %v168_v9 = vmul.f32 %v344_v5, %v124_v52 }
  0xe4   :  { %v126_v54 = vpop.f32.mrf.mxu0 }
  0xe5   :  { %v169_v8 = vmul.f32 %v344_v5, %v126_v54  ;;  %v176_v14 = vmul.f32 2.0, %v168_v9 }
  0xe6   :  { %v130_v55 = vpop.f32.mrf.mxu0 }
  0xe7   :  { %v170_v7 = vmul.f32 %v342_v1, %v130_v55  ;;  %v177_v20 = vmul.f32 2.0, %v169_v8 }
  0xe8   :  { %v132_v56 = vpop.f32.mrf.mxu0 }
  0xe9   :  { %v171_v6 = vmul.f32 %v342_v1, %v132_v56  ;;  %v178_v24 = vmul.f32 2.0, %v170_v7 }
  0xea   :  { %v136_v57 = vpop.f32.mrf.mxu0 }
  0xeb   :  { %v172_v4 = vmul.f32 %v514_v62, %v136_v57  ;;  %v179_v28 = vmul.f32 2.0, %v171_v6 }
  0xec   :  { %v138_v58 = vpop.f32.mrf.mxu0 }
  0xed   :  { %v173_v2 = vmul.f32 %v514_v62, %v138_v58  ;;  %v180_v30 = vmul.f32 2.0, %v172_v4 }
  0xee   :  { %v142_v59 = vpop.f32.mrf.mxu0 }
  0xef   :  { %v174_v0 = vmul.f32 %v512_v60, %v142_v59  ;;  %v181_v36 = vmul.f32 2.0, %v173_v2 }
  0xf0   :  { %v144_v61 = vpop.f32.mrf.mxu0 }
  0xf1   :  { %v517_v63 = vmul.f32 %v512_v60, %v144_v61  ;;  %v182_v42 = vmul.f32 2.0, %v174_v0 }
  0xf3   :  { %220 = vmatprep.subr.mxu1 %v517_v63  ;;  %v183_v48 = vmul.f32 2.0, %v517_v63 }
  0xf4   :  { %221 = vmatpush1.msra.mxu1 %v174_v0 }
  0xf5   :  { %222 = vmatprep.subr.mxu1 %v173_v2 }
  0xf6   :  { %223 = vmatpush1.msra.mxu1 %v172_v4 }
  0xf7   :  { %224 = vmatprep.subr.mxu1 %v171_v6 }
  0xf8   :  { %225 = vmatpush1.msra.mxu1 %v170_v7 }
  0xf9   :  { %226 = vmatprep.subr.mxu1 %v169_v8 }
  0xfa   :  { %227 = vmatpush1.msra.mxu1 %v168_v9 }
  0xfb   :  { %332 = vmatmul.mubr.msk.f32.vlgmr.msra.gmra.mxu1 %vm147_vm0, %v426_v17 }
  0xfc   :  { %266 = vmatprep.mubr.f32.mxu1 %v345_v3 }
  0xff   :  { %333 = vmatmul.mubr.msk.f32.gmra.mxu1 %vm147_vm0, %v421_v16 }
 0x100   :  { %272 = vmatprep.mubr.f32.mxu1 %v345_v3 }
 0x103   :  { %334 = vmatmul.mubr.msk.f32.gmra.mxu1 %vm147_vm0, %v443_v22 }
 0x104   :  { %278 = vmatprep.mubr.f32.mxu1 %v345_v3  ;;  %v301_v3 = vrot.slane %v57_v13, %v300_v15 }
 0x107   :  { %335 = vmatmul.mubr.msk.f32.gmra.mxu1 %vm147_vm0, %v431_v18 }
 0x1bb   :  { %v262_v16 = vpop.f32.mrf.mxu1 }
 0x1bc   :  { %v263_v17 = vadd.f32 %v262_v16, %v176_v14 }
 0x1bd   :  { %v264_v21 = vpop.f32.mrf.mxu1 }
 0x1be   :  { %v285_v22 = vmul.f32 %v344_v5, %v263_v17  ;;  %v265_v23 = vadd.f32 %v264_v21, %v177_v20 }
 0x1bf   :  { %v268_v25 = vpop.f32.mrf.mxu1 }
 0x1c0   :  { %v304_v18 = vadd.f32 %v297_v19, %v285_v22  ;;  %v286_v26 = vmul.f32 %v344_v5, %v265_v23  ;;  %v269_v27 = vadd.f32 %v268_v25, %v178_v24 }
 0x1c1   :  { %v270_v29 = vpop.f32.mrf.mxu1 }
 0x1c2   :  { %v312_v31 = vmax.f32 %v304_v18, 0.0  ;;  %v305_v32 = vadd.f32 %v301_v3, %v286_v26  ;;  %v287_v33 = vmul.f32 %v342_v1, %v269_v27  ;;  %v271_v34 = vadd.f32 %v270_v29, %v179_v28 }
 0x1c3   :  { %v274_v35 = vpop.f32.mrf.mxu1 }
 0x1c4   :  { %320 = vst [vmem:[%s570_s4] sm:$0xff] %v312_v31  ;;  %v313_v37 = vmax.f32 %v305_v32, 0.0  ;;  %v306_v38 = vadd.f32 %v297_v19, %v287_v33  ;;  %v288_v39 = vmul.f32 %v342_v1, %v271_v34  ;;  %v275_v40 = vadd.f32 %v274_v35, %v180_v30 }
 0x1c5   :  { %v276_v41 = vpop.f32.mrf.mxu1 }
 0x1c6   :  { %321 = vst [vmem:[%s570_s4 + $0x8] sm:$0xff] %v313_v37  ;;  %v314_v43 = vmax.f32 %v306_v38, 0.0  ;;  %v307_v44 = vadd.f32 %v301_v3, %v288_v39  ;;  %v289_v45 = vmul.f32 %v514_v62, %v275_v40  ;;  %v277_v46 = vadd.f32 %v276_v41, %v181_v36 }
 0x1c7   :  { %v280_v47 = vpop.f32.mrf.mxu1 }
 0x1c8   :  { %322 = vst [vmem:[%s570_s4 + $0x10] sm:$0xff] %v314_v43  ;;  %v315_v49 = vmax.f32 %v307_v44, 0.0  ;;  %v308_v50 = vadd.f32 %v297_v19, %v289_v45  ;;  %v290_v51 = vmul.f32 %v514_v62, %v277_v46  ;;  %v281_v52 = vadd.f32 %v280_v47, %v182_v42 }
 0x1c9   :  { %v282_v53 = vpop.f32.mrf.mxu1 }
 0x1ca   :  { %323 = vst [vmem:[%s570_s4 + $0x18] sm:$0xff] %v315_v49  ;;  %v316_v54 = vmax.f32 %v308_v50, 0.0  ;;  %v309_v55 = vadd.f32 %v301_v3, %v290_v51  ;;  %v291_v56 = vmul.f32 %v512_v60, %v281_v52  ;;  %v283_v57 = vadd.f32 %v282_v53, %v183_v48 }
 0x1cc   :  { %324 = vst [vmem:[%s570_s4 + $0x20] sm:$0xff] %v316_v54  ;;  %v317_v58 = vmax.f32 %v309_v55, 0.0  ;;  %v310_v59 = vadd.f32 %v297_v19, %v291_v56  ;;  %v292_v61 = vmul.f32 %v512_v60, %v283_v57 }
 0x1ce   :  { %325 = vst [vmem:[%s570_s4 + $0x28] sm:$0xff] %v317_v58  ;;  %v318_v62 = vmax.f32 %v310_v59, 0.0  ;;  %v311_v63 = vadd.f32 %v301_v3, %v292_v61 }
 0x1d0   :  { %326 = vst [vmem:[%s570_s4 + $0x30] sm:$0xff] %v318_v62  ;;  %v319_v0 = vmax.f32 %v311_v63, 0.0 }
 0x1d2   :  { %327 = vst [vmem:[%s570_s4 + $0x38] sm:$0xff] %v319_v0 }

// kernel: gunet_seg_forward.12
= control target key start
LH: loop header
LB: loop body
LE: loop exit
PB: predicated region body
PF: predicated region fallthrough
CT: control target
= control target key end

     0   :  { %v615_v3 = vmov 0.0   ;;  %vm616_vm0 = vmmov 0   ;;  %vm266_vm1 = vcmask 326656   ;;  %s948_s2 = inlined_call_operand.vmem [shape: f32[384,128], index: 2, kind: input, shape index: {}]   ;;  %s949_s0 = inlined_call_operand.vmem [shape: f32[40,384], index: 0, kind: input, shape index: {}]   ;;  %s950_s1 = inlined_call_operand.vmem [shape: f32[40,40], index: 1, kind: input, shape index: {}]   ;;  %s951_s3 = inlined_call_operand.vmem [shape: f32[1,128], index: 3, kind: input, shape index: {}]   ;;  %s952_s4 = inlined_call_operand.vmem [shape: f32[40,128], index: 4, kind: output, shape index: {}]  }
   0x1   :  { %v68_v0 = vld [vmem:[%s948_s2 + $0xf8] sm:$0xff]  ;;  %v67_v2 = vld [vmem:[%s948_s2 + $0xf0] sm:$0xff]  ;;  %521 = vmatprep.subr.mxu1 %v615_v3  ;;  %553 = vmatprep.mubr.msk.f32.mxu1 %vm616_vm0, %v615_v3  ;;  %v66_v6 = vld [vmem:[%s948_s2 + $0xe8] sm:$0xff] }
   0x2   :  { %v52_v1 = vld [vmem:[%s948_s2 + $0x78] sm:$0xff]  ;;  %443 = vmatprep.subr.mxu0 %v68_v0  ;;  %v51_v4 = vld [vmem:[%s948_s2 + $0x70] sm:$0xff]  ;;  %v50_v8 = vld [vmem:[%s948_s2 + $0x68] sm:$0xff] }
   0x3   :  { %v84_v5 = vld [vmem:[%s948_s2 + $0x178] sm:$0xff]  ;;  %444 = vmatpush3.msra.mxu0 %v52_v1  ;;  %v83_v7 = vld [vmem:[%s948_s2 + $0x170] sm:$0xff]  ;;  %v82_v9 = vld [vmem:[%s948_s2 + $0x168] sm:$0xff] }
   0x4   :  { %522 = vmatpush3.msra.mxu1 %v84_v5  ;;  %445 = vmatprep.subr.mxu0 %v67_v2  ;;  %v65_v10 = vld [vmem:[%s948_s2 + $0xe0] sm:$0xff]  ;;  %v64_v13 = vld [vmem:[%s948_s2 + $0xd8] sm:$0xff]  ;;  %v63_v16 = vld [vmem:[%s948_s2 + $0xd0] sm:$0xff] }
   0x5   :  { %523 = vmatprep.subr.mxu1 %v615_v3  ;;  %446 = vmatpush3.msra.mxu0 %v51_v4  ;;  %v49_v11 = vld [vmem:[%s948_s2 + $0x60] sm:$0xff]  ;;  %v48_v14 = vld [vmem:[%s948_s2 + $0x58] sm:$0xff]  ;;  %v47_v17 = vld [vmem:[%s948_s2 + $0x50] sm:$0xff] }
   0x6   :  { %524 = vmatpush3.msra.mxu1 %v83_v7  ;;  %447 = vmatprep.subr.mxu0 %v66_v6  ;;  %v81_v12 = vld [vmem:[%s948_s2 + $0x160] sm:$0xff]  ;;  %v80_v15 = vld [vmem:[%s948_s2 + $0x158] sm:$0xff]  ;;  %v79_v18 = vld [vmem:[%s948_s2 + $0x150] sm:$0xff] }
   0x7   :  { %525 = vmatprep.subr.mxu1 %v615_v3  ;;  %448 = vmatpush3.msra.mxu0 %v50_v8  ;;  %v62_v19 = vld [vmem:[%s948_s2 + $0xc8] sm:$0xff]  ;;  %v61_v22 = vld [vmem:[%s948_s2 + $0xc0] sm:$0xff]  ;;  %v60_v25 = vld [vmem:[%s948_s2 + $0xb8] sm:$0xff] }
   0x8   :  { %526 = vmatpush3.msra.mxu1 %v82_v9  ;;  %449 = vmatprep.subr.mxu0 %v65_v10  ;;  %v46_v20 = vld [vmem:[%s948_s2 + $0x48] sm:$0xff]  ;;  %v45_v23 = vld [vmem:[%s948_s2 + $0x40] sm:$0xff]  ;;  %v44_v26 = vld [vmem:[%s948_s2 + $0x38] sm:$0xff] }
   0x9   :  { %527 = vmatprep.subr.mxu1 %v615_v3  ;;  %450 = vmatpush3.msra.mxu0 %v49_v11  ;;  %v78_v21 = vld [vmem:[%s948_s2 + $0x148] sm:$0xff]  ;;  %v77_v24 = vld [vmem:[%s948_s2 + $0x140] sm:$0xff]  ;;  %v76_v27 = vld [vmem:[%s948_s2 + $0x138] sm:$0xff] }
   0xa   :  { %528 = vmatpush3.msra.mxu1 %v81_v12  ;;  %451 = vmatprep.subr.mxu0 %v64_v13  ;;  %v59_v28 = vld [vmem:[%s948_s2 + $0xb0] sm:$0xff]  ;;  %v58_v31 = vld [vmem:[%s948_s2 + $0xa8] sm:$0xff]  ;;  %v57_v34 = vld [vmem:[%s948_s2 + $0xa0] sm:$0xff] }
   0xb   :  { %529 = vmatprep.subr.mxu1 %v615_v3  ;;  %452 = vmatpush3.msra.mxu0 %v48_v14  ;;  %v43_v29 = vld [vmem:[%s948_s2 + $0x30] sm:$0xff]  ;;  %v42_v32 = vld [vmem:[%s948_s2 + $0x28] sm:$0xff]  ;;  %v41_v35 = vld [vmem:[%s948_s2 + $0x20] sm:$0xff] }
   0xc   :  { %530 = vmatpush3.msra.mxu1 %v80_v15  ;;  %453 = vmatprep.subr.mxu0 %v63_v16  ;;  %v75_v30 = vld [vmem:[%s948_s2 + $0x130] sm:$0xff]  ;;  %v74_v33 = vld [vmem:[%s948_s2 + $0x128] sm:$0xff]  ;;  %v73_v36 = vld [vmem:[%s948_s2 + $0x120] sm:$0xff] }
   0xd   :  { %531 = vmatprep.subr.mxu1 %v615_v3  ;;  %454 = vmatpush3.msra.mxu0 %v47_v17  ;;  %v56_v37 = vld [vmem:[%s948_s2 + $0x98] sm:$0xff]  ;;  %v55_v40 = vld [vmem:[%s948_s2 + $0x90] sm:$0xff]  ;;  %v54_v43 = vld [vmem:[%s948_s2 + $0x88] sm:$0xff] }
   0xe   :  { %532 = vmatpush3.msra.mxu1 %v79_v18  ;;  %455 = vmatprep.subr.mxu0 %v62_v19  ;;  %v40_v38 = vld [vmem:[%s948_s2 + $0x18] sm:$0xff]  ;;  %v39_v41 = vld [vmem:[%s948_s2 + $0x10] sm:$0xff]  ;;  %v38_v44 = vld [vmem:[%s948_s2 + $0x8] sm:$0xff] }
   0xf   :  { %533 = vmatprep.subr.mxu1 %v615_v3  ;;  %456 = vmatpush3.msra.mxu0 %v46_v20  ;;  %v72_v39 = vld [vmem:[%s948_s2 + $0x118] sm:$0xff]  ;;  %v71_v42 = vld [vmem:[%s948_s2 + $0x110] sm:$0xff]  ;;  %v18_v45 = vld [vmem:[%s949_s0 + $0x8] sm:$0xff] }
  0x10   :  { %534 = vmatpush3.msra.mxu1 %v78_v21  ;;  %457 = vmatprep.subr.mxu0 %v61_v22  ;;  %v53_v46 = vld [vmem:[%s948_s2 + $0x80] sm:$0xff]  ;;  %v70_v47 = vld [vmem:[%s948_s2 + $0x108] sm:$0xff]  ;;  %v817_v52 = vld [vmem:[%s950_s1 + $0x10] sm:$0xff] }
  0x11   :  { %535 = vmatprep.subr.mxu1 %v615_v3  ;;  %458 = vmatpush3.msra.mxu0 %v45_v23  ;;  %v37_v48 = vld [vmem:[%s948_s2] sm:$0xff]  ;;  %v19_v53 = vld [vmem:[%s949_s0 + $0x10] sm:$0xff]  ;;  %v831_v56 = vld [vmem:[%s950_s1 + $0x18] sm:$0xff]  ;;  %v273_v57 = vsel %vm266_vm1, %v817_v52, 0.0 }
  0x12   :  { %536 = vmatpush3.msra.mxu1 %v77_v24  ;;  %459 = vmatprep.subr.mxu0 %v60_v25  ;;  %v806_v49 = vld [vmem:[%s950_s1 + $0x20] sm:$0xff]  ;;  %v20_v58 = vld [vmem:[%s949_s0 + $0x18] sm:$0xff]  ;;  %v841_v59 = vld [vmem:[%s950_s1 + $0x8] sm:$0xff]  ;;  %v276_v62 = vsel %vm266_vm1, %v831_v56, 0.0 }
  0x13   :  { %537 = vmatprep.subr.mxu1 %v615_v3  ;;  %460 = vmatpush3.msra.mxu0 %v44_v26  ;;  %v17_v50 = vld [vmem:[%s949_s0] sm:$0xff]  ;;  %v279_v55 = vsel %vm266_vm1, %v806_v49, 0.0  ;;  %v22_v60 = vld [vmem:[%s949_s0 + $0x28] sm:$0xff]  ;;  %v24_v61 = vld [vmem:[%s949_s0 + $0x38] sm:$0xff]  ;;  %v270_v0 = vsel %vm266_vm1, %v841_v59, 0.0 }
  0x14   :  { %538 = vmatpush3.msra.mxu1 %v76_v27  ;;  %461 = vmatprep.subr.mxu0 %v59_v28  ;;  %v69_v51 = vld [vmem:[%s948_s2 + $0x100] sm:$0xff]  ;;  %v23_v1 = vld [vmem:[%s949_s0 + $0x30] sm:$0xff]  ;;  %v26_v6 = vld [vmem:[%s949_s0 + $0x48] sm:$0xff] }
  0x15   :  { %539 = vmatprep.subr.mxu1 %v615_v3  ;;  %462 = vmatpush3.msra.mxu0 %v43_v29  ;;  %v21_v54 = vld [vmem:[%s949_s0 + $0x20] sm:$0xff]  ;;  %v27_v4 = vld [vmem:[%s949_s0 + $0x50] sm:$0xff]  ;;  %v28_v7 = vld [vmem:[%s949_s0 + $0x58] sm:$0xff] }
  0x16   :  { %540 = vmatpush3.msra.mxu1 %v75_v30  ;;  %463 = vmatprep.subr.mxu0 %v58_v31  ;;  %v857_v63 = vld [vmem:[%s950_s1] sm:$0xff]  ;;  %v30_v8 = vld [vmem:[%s949_s0 + $0x68] sm:$0xff]  ;;  %v31_v10 = vld [vmem:[%s949_s0 + $0x70] sm:$0xff] }
  0x17   :  { %541 = vmatprep.subr.mxu1 %v615_v3  ;;  %464 = vmatpush3.msra.mxu0 %v42_v32  ;;  %v25_v2 = vld [vmem:[%s949_s0 + $0x40] sm:$0xff]  ;;  %v267_v5 = vsel %vm266_vm1, %v857_v63, 0.0 }
  0x18   :  { %542 = vmatpush3.msra.mxu1 %v74_v33  ;;  %465 = vmatprep.subr.mxu0 %v57_v34  ;;  %v29_v9 = vld [vmem:[%s949_s0 + $0x60] sm:$0xff] }
  0x19   :  { %543 = vmatprep.subr.mxu1 %v615_v3  ;;  %466 = vmatpush3.msra.mxu0 %v41_v35 }
  0x1a   :  { %544 = vmatpush3.msra.mxu1 %v73_v36  ;;  %467 = vmatprep.subr.mxu0 %v56_v37 }
  0x1b   :  { %545 = vmatprep.subr.mxu1 %v615_v3  ;;  %468 = vmatpush3.msra.mxu0 %v40_v38 }
  0x1c   :  { %546 = vmatpush3.msra.mxu1 %v72_v39  ;;  %469 = vmatprep.subr.mxu0 %v55_v40 }
  0x1d   :  { %547 = vmatprep.subr.mxu1 %v615_v3  ;;  %470 = vmatpush3.msra.mxu0 %v39_v41 }
  0x1e   :  { %548 = vmatpush3.msra.mxu1 %v71_v42  ;;  %471 = vmatprep.subr.mxu0 %v54_v43 }
  0x1f   :  { %549 = vmatprep.subr.mxu1 %v615_v3  ;;  %472 = vmatpush3.msra.mxu0 %v38_v44 }
  0x20   :  { %150 = vmatprep.mubr.f32.mxu0 %v18_v45  ;;  %473 = vmatprep.subr.mxu0 %v53_v46 }
  0x21   :  { %550 = vmatpush3.msra.mxu1 %v70_v47  ;;  %474 = vmatpush3.msra.mxu0 %v37_v48 }
  0x22   :  { %551 = vmatprep.subr.mxu1 %v615_v3  ;;  %151 = vmatmul.mubr.f32.vlgmr.msra.gmra.mxu0 %v17_v50 }
  0x23   :  { %552 = vmatpush3.msra.mxu1 %v69_v51  ;;  %155 = vmatprep.mubr.f32.mxu0 %v21_v54 }
  0x24   :  { %554 = vmatmul.mubr.f32.vlgmr.msra.gmra.mxu1 %v19_v53  ;;  %280 = vadd.xlane.f32.xlu0 %v279_v55 }
  0x25   :  { %556 = vmatprep.mubr.msk.f32.mxu1 %vm616_vm0, %v615_v3  ;;  %274 = vadd.xlane.f32.xlu1 %v273_v57 }
  0x26   :  { %568 = vmatprep.subr.mxu0 %v615_v3  ;;  %156 = vmatmul.mubr.f32.gmra.mxu0 %v20_v58 }
  0x27   :  { %593 = vmatprep.subr.mxu1 %v615_v3  ;;  %160 = vmatprep.mubr.f32.mxu0 %v24_v61 }
  0x28   :  { %557 = vmatmul.mubr.f32.gmra.mxu1 %v22_v60  ;;  %277 = vadd.xlane.f32.xlu0 %v276_v62 }
  0x29   :  { %559 = vmatprep.mubr.msk.f32.mxu1 %vm616_vm0, %v615_v3  ;;  %271 = vadd.xlane.f32.xlu1 %v270_v0 }
  0x2a   :  { %161 = vmatmul.mubr.f32.gmra.mxu0 %v23_v1 }
  0x2b   :  { %165 = vmatprep.mubr.f32.mxu0 %v27_v4 }
  0x2c   :  { %560 = vmatmul.mubr.f32.gmra.mxu1 %v25_v2  ;;  %268 = vadd.xlane.f32.xlu0 %v267_v5 }
  0x2d   :  { %562 = vmatprep.mubr.msk.f32.mxu1 %vm616_vm0, %v615_v3 }
  0x2e   :  { %166 = vmatmul.mubr.f32.gmra.mxu0 %v26_v6 }
  0x2f   :  { %170 = vmatprep.mubr.f32.mxu0 %v30_v8 }
  0x30   :  { %563 = vmatmul.mubr.f32.gmra.mxu1 %v28_v7  ;;  %v442_v7 = vld [vmem:[%s951_s3] ss:$0 sm:$0xff] }
  0x31   :  { %565 = vmatprep.mubr.msk.f32.mxu1 %vm616_vm0, %v615_v3 }
  0x32   :  { %171 = vmatmul.mubr.f32.gmra.mxu0 %v29_v9 }
  0x33   :  { %578 = vmatprep.mubr.msk.f32.mxu0 %vm616_vm0, %v615_v3 }
  0x34   :  { %566 = vmatmul.mubr.f32.gmra.mxu1 %v31_v10 }
  0x35   :  { %587 = vmatprep.mubr.msk.f32.mxu1 %vm616_vm0, %v615_v3 }
  0xad   :  { %v281_v11 = vpop.xlane.xlu0 %280 }
  0xae   :  { %v275_v12 = vpop.xlane.xlu1 %274  ;;  %v286_v18 = vadd.f32 2.0, %v281_v11 }
  0xaf   :  { %v284_v24 = vadd.f32 2.0, %v275_v12 }
  0xb0   :  { %605 = vrsqrt.f32 %v286_v18 }
  0xb1   :  { %v278_v15 = vpop.xlane.xlu0 %277 }
  0xb2   :  { %v285_v20 = vadd.f32 2.0, %v278_v15  ;;  %v272_v22 = vpop.xlane.xlu1 %271 }
  0xb3   :  { %v283_v28 = vadd.f32 2.0, %v272_v22 }
  0xb4   :  { %607 = vrsqrt.f32 %v285_v20 }
  0xb5   :  { %v269_v26 = vpop.xlane.xlu0 %268  ;;  %609 = vrsqrt.f32 %v284_v24 }
  0xb6   :  { %v282_v31 = vadd.f32 2.0, %v269_v26  ;;  %611 = vrsqrt.f32 %v283_v28 }
  0xb8   :  { %613 = vrsqrt.f32 %v282_v31 }
  0xbd   :  { %v898_v44 = vpop.eup %605 }
  0xc1   :  { %v608_v48 = vpop.eup %607 }
  0xc2   :  { %v901_v54 = vpop.eup %609 }
  0xc3   :  { %v612_v58 = vpop.eup %611 }
  0xc5   :  { %v614_v62 = vpop.eup %613 }
  0xe2   :  { %v475_v13 = vpop.f32.mrf.mxu0 }
  0xe4   :  { %v242_v14 = vpop.f32.mrf.mxu1  ;;  %v476_v16 = vpop.f32.mrf.mxu0 }
  0xe5   :  { %v477_v50 = vadd.f32 %v476_v16, %v475_v13 }
  0xe6   :  { %v555_v17 = vpop.f32.mrf.mxu1  ;;  %v478_v19 = vpop.f32.mrf.mxu0 }
  0xe7   :  { %v243_v60 = vadd.f32 %v477_v50, %v242_v14 }
  0xe8   :  { %v247_v21 = vpop.f32.mrf.mxu1  ;;  %v479_v23 = vpop.f32.mrf.mxu0 }
  0xe9   :  { %v480_v45 = vadd.f32 %v479_v23, %v478_v19  ;;  %v292_v1 = vmul.f32 %v614_v62, %v243_v60 }
  0xea   :  { %v558_v25 = vpop.f32.mrf.mxu1  ;;  %v481_v27 = vpop.f32.mrf.mxu0 }
  0xeb   :  { %v248_v55 = vadd.f32 %v480_v45, %v247_v21 }
  0xec   :  { %v252_v29 = vpop.f32.mrf.mxu1  ;;  %v482_v30 = vpop.f32.mrf.mxu0 }
  0xed   :  { %v483_v41 = vadd.f32 %v482_v30, %v481_v27  ;;  %v293_v0 = vmul.f32 %v612_v58, %v248_v55 }
  0xee   :  { %v561_v32 = vpop.f32.mrf.mxu1  ;;  %v484_v33 = vpop.f32.mrf.mxu0 }
  0xef   :  { %v253_v51 = vadd.f32 %v483_v41, %v252_v29  ;;  %v298_v10 = vmul.f32 2.0, %v293_v0 }
  0xf0   :  { %v257_v34 = vpop.f32.mrf.mxu1  ;;  %v485_v35 = vpop.f32.mrf.mxu0 }
  0xf1   :  { %v486_v38 = vadd.f32 %v485_v35, %v484_v33  ;;  %v294_v61 = vmul.f32 %v901_v54, %v253_v51 }
  0xf2   :  { %v564_v36 = vpop.f32.mrf.mxu1  ;;  %v487_v37 = vpop.f32.mrf.mxu0 }
  0xf3   :  { %v258_v46 = vadd.f32 %v486_v38, %v257_v34  ;;  %v299_v17 = vmul.f32 2.0, %v294_v61 }
  0xf4   :  { %v262_v39 = vpop.f32.mrf.mxu1  ;;  %v488_v40 = vpop.f32.mrf.mxu0 }
  0xf5   :  { %v489_v42 = vadd.f32 %v488_v40, %v487_v37  ;;  %v295_v57 = vmul.f32 %v608_v48, %v258_v46 }
  0xf6   :  { %v567_v43 = vpop.f32.mrf.mxu1 }
  0xf7   :  { %v263_v47 = vadd.f32 %v489_v42, %v262_v39 }
  0xf9   :  { %v296_v53 = vmul.f32 %v898_v44, %v263_v47 }
  0xfb   :  { %569 = vmatpush3.msra.mxu0 %v296_v53  ;;  %598 = vmatpush3.msra.mxu1 %v296_v53  ;;  %v301_v11 = vmul.f32 2.0, %v296_v53 }
  0xfc   :  { %570 = vmatprep.subr.mxu0 %v615_v3  ;;  %594 = vmatprep.subr.mxu1 %v615_v3 }
  0xfd   :  { %571 = vmatpush3.msra.mxu0 %v295_v57  ;;  %599 = vmatpush3.msra.mxu1 %v295_v57 }
  0xfe   :  { %572 = vmatprep.subr.mxu0 %v615_v3  ;;  %595 = vmatprep.subr.mxu1 %v615_v3 }
  0xff   :  { %573 = vmatpush3.msra.mxu0 %v294_v61  ;;  %600 = vmatpush3.msra.mxu1 %v294_v61 }
 0x100   :  { %574 = vmatprep.subr.mxu0 %v615_v3  ;;  %596 = vmatprep.subr.mxu1 %v615_v3 }
 0x101   :  { %575 = vmatpush3.msra.mxu0 %v293_v0  ;;  %601 = vmatpush3.msra.mxu1 %v293_v0 }
 0x102   :  { %576 = vmatprep.subr.mxu0 %v615_v3  ;;  %597 = vmatprep.subr.mxu1 %v615_v3 }
 0x103   :  { %577 = vmatpush3.msra.mxu0 %v292_v1  ;;  %602 = vmatpush3.msra.mxu1 %v292_v1 }
 0x104   :  { %579 = vmatmul.mubr.msk.f32.vlgmr.msra.gmra.mxu0 %vm266_vm1, %v857_v63  ;;  %588 = vmatmul.mubr.msk.f32.vlgmr.msra.gmra.mxu1 %vm266_vm1, %v831_v56  ;;  %v297_v63 = vmul.f32 2.0, %v292_v1  ;;  %v300_v56 = vmul.f32 2.0, %v295_v57 }
 0x105   :  { %581 = vmatprep.mubr.msk.f32.mxu0 %vm616_vm0, %v615_v3  ;;  %590 = vmatprep.mubr.msk.f32.mxu1 %vm616_vm0, %v615_v3 }
 0x108   :  { %582 = vmatmul.mubr.msk.f32.gmra.mxu0 %vm266_vm1, %v841_v59  ;;  %591 = vmatmul.mubr.msk.f32.gmra.mxu1 %vm266_vm1, %v806_v49 }
 0x109   :  { %584 = vmatprep.mubr.msk.f32.mxu0 %vm616_vm0, %v615_v3 }
 0x10c   :  { %585 = vmatmul.mubr.msk.f32.gmra.mxu0 %vm266_vm1, %v817_v52 }
 0x1c4   :  { %v383_v2 = vpop.f32.mrf.mxu0  ;;  %v398_v4 = vpop.f32.mrf.mxu1 }
 0x1c5   :  { %v384_v5 = vadd.f32 %v383_v2, %v297_v63  ;;  %v399_v6 = vadd.f32 %v398_v4, %v300_v56 }
 0x1c6   :  { %v580_v59 = vpop.f32.mrf.mxu0  ;;  %v589_v8 = vpop.f32.mrf.mxu1 }
 0x1c7   :  { %v407_v9 = vmul.f32 %v614_v62, %v384_v5  ;;  %v410_v49 = vmul.f32 %v608_v48, %v399_v6 }
 0x1c8   :  { %v388_v3 = vpop.f32.mrf.mxu0  ;;  %v403_v12 = vpop.f32.mrf.mxu1 }
 0x1c9   :  { %v418_v13 = vadd.f32 %v442_v7, %v407_v9  ;;  %v421_v52 = vadd.f32 %v442_v7, %v410_v49  ;;  %v389_v14 = vadd.f32 %v388_v3, %v298_v10  ;;  %v404_v15 = vadd.f32 %v403_v12, %v301_v11 }
 0x1ca   :  { %v583_v16 = vpop.f32.mrf.mxu0  ;;  %v592_v18 = vpop.f32.mrf.mxu1 }
 0x1cb   :  { %v423_v19 = vmax.f32 %v418_v13, 0.0  ;;  %v426_v20 = vmax.f32 %v421_v52, 0.0  ;;  %v408_v21 = vmul.f32 %v612_v58, %v389_v14  ;;  %v411_v22 = vmul.f32 %v898_v44, %v404_v15 }
 0x1cc   :  { %v393_v23 = vpop.f32.mrf.mxu0 }
 0x1cd   :  { %428 = vst [vmem:[%s952_s4] sm:$0xff] %v423_v19  ;;  %431 = vst [vmem:[%s952_s4 + $0x18] sm:$0xff] %v426_v20  ;;  %v419_v24 = vadd.f32 %v442_v7, %v408_v21  ;;  %v422_v25 = vadd.f32 %v442_v7, %v411_v22  ;;  %v394_v26 = vadd.f32 %v393_v23, %v299_v17 }
 0x1ce   :  { %v586_v27 = vpop.f32.mrf.mxu0 }
 0x1cf   :  { %v424_v28 = vmax.f32 %v419_v24, 0.0  ;;  %v427_v29 = vmax.f32 %v422_v25, 0.0  ;;  %v409_v30 = vmul.f32 %v901_v54, %v394_v26 }
 0x1d1   :  { %429 = vst [vmem:[%s952_s4 + $0x8] sm:$0xff] %v424_v28  ;;  %432 = vst [vmem:[%s952_s4 + $0x20] sm:$0xff] %v427_v29  ;;  %v420_v31 = vadd.f32 %v442_v7, %v409_v30 }
 0x1d3   :  { %v425_v32 = vmax.f32 %v420_v31, 0.0 }
 0x1d5   :  { %430 = vst [vmem:[%s952_s4 + $0x10] sm:$0xff] %v425_v32 }

// kernel: gunet_seg_forward.13
= control target key start
LH: loop header
LB: loop body
LE: loop exit
PB: predicated region body
PF: predicated region fallthrough
CT: control target
= control target key end

     0   :  { %v510_v0 = vmov 0.0   ;;  %vm60_vm0 = vcmask 523264   ;;  %vm174_vm1 = vcmask 392192   ;;  %s759_s2 = inlined_call_operand.vmem [shape: f32[192,128], index: 2, kind: input, shape index: {}]   ;;  %s760_s0 = inlined_call_operand.vmem [shape: f32[48,192], index: 0, kind: input, shape index: {}]   ;;  %s761_s1 = inlined_call_operand.vmem [shape: f32[48,48], index: 1, kind: input, shape index: {}]   ;;  %s762_s3 = inlined_call_operand.vmem [shape: f32[1,128], index: 3, kind: input, shape index: {}]   ;;  %s763_s4 = inlined_call_operand.vmem [shape: f32[48,128], index: 4, kind: output, shape index: {}]  }
   0x1   :  { %79 = vmatprep.subr.mxu0 %v510_v0  ;;  %v50_v1 = vld [vmem:[%s759_s2 + $0x78] sm:$0xff]  ;;  %v49_v2 = vld [vmem:[%s759_s2 + $0x70] sm:$0xff]  ;;  %v48_v3 = vld [vmem:[%s759_s2 + $0x68] sm:$0xff] }
   0x2   :  { %80 = vmatpush1.msra.mxu0 %v50_v1  ;;  %v47_v4 = vld [vmem:[%s759_s2 + $0x60] sm:$0xff]  ;;  %v46_v5 = vld [vmem:[%s759_s2 + $0x58] sm:$0xff]  ;;  %v45_v6 = vld [vmem:[%s759_s2 + $0x50] sm:$0xff] }
   0x3   :  { %81 = vmatprep.subr.mxu0 %v510_v0  ;;  %v18_v7 = vld [vmem:[%s760_s0 + $0x8] sm:$0xff]  ;;  %v43_v9 = vld [vmem:[%s759_s2 + $0x40] sm:$0xff]  ;;  %v574_v10 = vld [vmem:[%s761_s1 + $0x18] sm:$0xff] }
   0x4   :  { %82 = vmatpush1.msra.mxu0 %v49_v2  ;;  %427 = vmatprep.mubr.msk.f32.mxu0 %vm60_vm0, %v18_v7  ;;  %v44_v8 = vld [vmem:[%s759_s2 + $0x48] sm:$0xff]  ;;  %v584_v12 = vld [vmem:[%s761_s1 + $0x10] sm:$0xff]  ;;  %v184_v13 = vsel %vm174_vm1, %v574_v10, 0.0  ;;  %v593_v15 = vld [vmem:[%s761_s1 + $0x20] sm:$0xff] }
   0x5   :  { %83 = vmatprep.subr.mxu0 %v510_v0  ;;  %v579_v11 = vld [vmem:[%s761_s1 + $0x28] sm:$0xff]  ;;  %v42_v16 = vld [vmem:[%s759_s2 + $0x38] sm:$0xff]  ;;  %185 = vadd.xlane.f32.xlu1 %v184_v13  ;;  %v181_v17 = vsel %vm174_vm1, %v584_v12, 0.0  ;;  %v29_v18 = vld [vmem:[%s761_s1] sm:$0xff]  ;;  %v187_v20 = vsel %vm174_vm1, %v593_v15, 0.0 }
   0x6   :  { %84 = vmatpush1.msra.mxu0 %v48_v3  ;;  %v190_v14 = vsel %vm174_vm1, %v579_v11, 0.0  ;;  %v41_v19 = vld [vmem:[%s759_s2 + $0x30] sm:$0xff]  ;;  %464 = vmatprep.mubr.msk.f32.mxu1 %vm174_vm1, %v29_v18  ;;  %v614_v21 = vld [vmem:[%s761_s1 + $0x8] sm:$0xff]  ;;  %v175_v23 = vsel %vm174_vm1, %v29_v18, 0.0  ;;  %v39_v24 = vld [vmem:[%s759_s2 + $0x20] sm:$0xff] }
   0x7   :  { %85 = vmatprep.subr.mxu0 %v510_v0  ;;  %191 = vadd.xlane.f32.xlu0 %v190_v14  ;;  %v40_v22 = vld [vmem:[%s759_s2 + $0x28] sm:$0xff]  ;;  %v178_v25 = vsel %vm174_vm1, %v614_v21, 0.0  ;;  %v38_v26 = vld [vmem:[%s759_s2 + $0x18] sm:$0xff]  ;;  %v37_v27 = vld [vmem:[%s759_s2 + $0x10] sm:$0xff] }
   0x8   :  { %86 = vmatpush1.msra.mxu0 %v47_v4  ;;  %v36_v28 = vld [vmem:[%s759_s2 + $0x8] sm:$0xff]  ;;  %v35_v29 = vld [vmem:[%s759_s2] sm:$0xff]  ;;  %v58_v30 = vld [vmem:[%s759_s2 + $0xb8] sm:$0xff] }
   0x9   :  { %87 = vmatprep.subr.mxu0 %v510_v0  ;;  %182 = vadd.xlane.f32.xlu1 %v181_v17  ;;  %v57_v31 = vld [vmem:[%s759_s2 + $0xb0] sm:$0xff]  ;;  %v56_v32 = vld [vmem:[%s759_s2 + $0xa8] sm:$0xff]  ;;  %v55_v33 = vld [vmem:[%s759_s2 + $0xa0] sm:$0xff] }
   0xa   :  { %88 = vmatpush1.msra.mxu0 %v46_v5  ;;  %v54_v34 = vld [vmem:[%s759_s2 + $0x98] sm:$0xff]  ;;  %v53_v35 = vld [vmem:[%s759_s2 + $0x90] sm:$0xff]  ;;  %v52_v36 = vld [vmem:[%s759_s2 + $0x88] sm:$0xff] }
   0xb   :  { %89 = vmatprep.subr.mxu0 %v510_v0  ;;  %188 = vadd.xlane.f32.xlu0 %v187_v20  ;;  %v51_v37 = vld [vmem:[%s759_s2 + $0x80] sm:$0xff]  ;;  %v20_v39 = vld [vmem:[%s760_s0 + $0x18] sm:$0xff]  ;;  %v19_v40 = vld [vmem:[%s760_s0 + $0x10] sm:$0xff] }
   0xc   :  { %90 = vmatpush1.msra.mxu0 %v45_v6  ;;  %v17_v38 = vld [vmem:[%s760_s0] sm:$0xff]  ;;  %v22_v41 = vld [vmem:[%s760_s0 + $0x28] sm:$0xff]  ;;  %v24_v43 = vld [vmem:[%s760_s0 + $0x38] sm:$0xff] }
   0xd   :  { %91 = vmatprep.subr.mxu0 %v510_v0  ;;  %176 = vadd.xlane.f32.xlu1 %v175_v23  ;;  %v21_v42 = vld [vmem:[%s760_s0 + $0x20] sm:$0xff]  ;;  %v23_v44 = vld [vmem:[%s760_s0 + $0x30] sm:$0xff]  ;;  %v26_v45 = vld [vmem:[%s760_s0 + $0x48] sm:$0xff] }
   0xe   :  { %92 = vmatpush1.msra.mxu0 %v44_v8  ;;  %v25_v46 = vld [vmem:[%s760_s0 + $0x40] sm:$0xff]  ;;  %v28_v47 = vld [vmem:[%s760_s0 + $0x58] sm:$0xff]  ;;  %v27_v48 = vld [vmem:[%s760_s0 + $0x50] sm:$0xff] }
   0xf   :  { %93 = vmatprep.subr.mxu0 %v510_v0  ;;  %179 = vadd.xlane.f32.xlu0 %v178_v25 }
  0x10   :  { %94 = vmatpush1.msra.mxu0 %v43_v9 }
  0x11   :  { %95 = vmatprep.subr.mxu0 %v510_v0 }
  0x12   :  { %96 = vmatpush1.msra.mxu0 %v42_v16 }
  0x13   :  { %97 = vmatprep.subr.mxu0 %v510_v0 }
  0x14   :  { %98 = vmatpush1.msra.mxu0 %v41_v19 }
  0x15   :  { %99 = vmatprep.subr.mxu0 %v510_v0 }
  0x16   :  { %100 = vmatpush1.msra.mxu0 %v40_v22 }
  0x17   :  { %101 = vmatprep.subr.mxu0 %v510_v0 }
  0x18   :  { %102 = vmatpush1.msra.mxu0 %v39_v24 }
  0x19   :  { %103 = vmatprep.subr.mxu0 %v510_v0 }
  0x1a   :  { %104 = vmatpush1.msra.mxu0 %v38_v26  ;;  %v348_v26 = vlaneseq }
  0x1b   :  { %105 = vmatprep.subr.mxu0 %v510_v0 }
  0x1c   :  { %106 = vmatpush1.msra.mxu0 %v37_v27 }
  0x1d   :  { %107 = vmatprep.subr.mxu0 %v510_v0 }
  0x1e   :  { %108 = vmatpush1.msra.mxu0 %v36_v28 }
  0x1f   :  { %109 = vmatprep.subr.mxu0 %v510_v0 }
  0x20   :  { %110 = vmatpush1.msra.mxu0 %v35_v29  ;;  %v349_v29 = vand.u32 127, %v348_v26 }
  0x21   :  { %127 = vmatprep.subr.mxu0 %v510_v0 }
  0x22   :  { %128 = vmatpush2.msra.mxu0 %v58_v30  ;;  %vm350_vm2 = vcmp.lt.s32.totalorder %v349_v29, 8 }
  0x23   :  { %129 = vmatprep.subr.mxu0 %v510_v0 }
  0x24   :  { %130 = vmatpush2.msra.mxu0 %v57_v31 }
  0x25   :  { %131 = vmatprep.subr.mxu0 %v510_v0 }
  0x26   :  { %132 = vmatpush2.msra.mxu0 %v56_v32 }
  0x27   :  { %133 = vmatprep.subr.mxu0 %v510_v0 }
  0x28   :  { %134 = vmatpush2.msra.mxu0 %v55_v33 }
  0x29   :  { %135 = vmatprep.subr.mxu0 %v510_v0 }
  0x2a   :  { %136 = vmatpush2.msra.mxu0 %v54_v34 }
  0x2b   :  { %137 = vmatprep.subr.mxu0 %v510_v0 }
  0x2c   :  { %138 = vmatpush2.msra.mxu0 %v53_v35 }
  0x2d   :  { %139 = vmatprep.subr.mxu0 %v510_v0 }
  0x2e   :  { %140 = vmatpush2.msra.mxu0 %v52_v36 }
  0x2f   :  { %141 = vmatprep.subr.mxu0 %v510_v0 }
  0x30   :  { %142 = vmatpush2.msra.mxu0 %v51_v37 }
  0x31   :  { %144 = vmatmul.mubr.f32.vlgmr.msra.gmra.mxu0 %v17_v38 }
  0x32   :  { %428 = vmatprep.mubr.msk.f32.mxu0 %vm60_vm0, %v20_v39 }
  0x35   :  { %149 = vmatmul.mubr.f32.gmra.mxu0 %v19_v40 }
  0x36   :  { %429 = vmatprep.mubr.msk.f32.mxu0 %vm60_vm0, %v22_v41 }
  0x39   :  { %154 = vmatmul.mubr.f32.gmra.mxu0 %v21_v42 }
  0x3a   :  { %430 = vmatprep.mubr.msk.f32.mxu0 %vm60_vm0, %v24_v43 }
  0x3d   :  { %159 = vmatmul.mubr.f32.gmra.mxu0 %v23_v44 }
  0x3e   :  { %431 = vmatprep.mubr.msk.f32.mxu0 %vm60_vm0, %v26_v45 }
  0x41   :  { %164 = vmatmul.mubr.f32.gmra.mxu0 %v25_v46 }
  0x42   :  { %432 = vmatprep.mubr.msk.f32.mxu0 %vm60_vm0, %v28_v47 }
  0x45   :  { %169 = vmatmul.mubr.f32.gmra.mxu0 %v27_v48 }
  0x8e   :  { %v186_v50 = vpop.xlane.xlu1 %185 }
  0x8f   :  { %v196_v58 = vadd.f32 2.0, %v186_v50 }
  0x90   :  { %v192_v49 = vpop.xlane.xlu0 %191 }
  0x91   :  { %v198_v53 = vadd.f32 2.0, %v192_v49 }
  0x92   :  { %v183_v54 = vpop.xlane.xlu1 %182 }
  0x93   :  { %474 = vrsqrt.f32 %v198_v53  ;;  %v195_v61 = vadd.f32 2.0, %v183_v54 }
  0x94   :  { %v189_v51 = vpop.xlane.xlu0 %188 }
  0x95   :  { %v197_v56 = vadd.f32 2.0, %v189_v51 }
  0x96   :  { %v177_v62 = vpop.xlane.xlu1 %176 }
  0x97   :  { %476 = vrsqrt.f32 %v197_v56  ;;  %v193_v2 = vadd.f32 2.0, %v177_v62 }
  0x98   :  { %v180_v59 = vpop.xlane.xlu0 %179  ;;  %478 = vrsqrt.f32 %v196_v58 }
  0x99   :  { %v194_v0 = vadd.f32 2.0, %v180_v59  ;;  %480 = vrsqrt.f32 %v195_v61 }
  0x9b   :  { %482 = vrsqrt.f32 %v194_v0 }
  0x9c   :  { %484 = vrsqrt.f32 %v193_v2 }
  0xa0   :  { %v714_v7 = vpop.eup %474 }
  0xa4   :  { %v716_v8 = vpop.eup %476 }
  0xa5   :  { %v479_v14 = vpop.eup %478 }
  0xa6   :  { %v481_v18 = vpop.eup %480 }
  0xa8   :  { %v483_v20 = vpop.eup %482 }
  0xa9   :  { %v485_v23 = vpop.eup %484 }
  0xf1   :  { %v145_v52 = vpop.f32.mrf.mxu0 }
  0xf2   :  { %v205_v25 = vmul.f32 %v485_v23, %v145_v52 }
  0xf3   :  { %v147_v55 = vpop.f32.mrf.mxu0 }
  0xf4   :  { %v211_v31 = vmul.f32 2.0, %v205_v25 }
  0xf5   :  { %v150_v57 = vpop.f32.mrf.mxu0 }
  0xf6   :  { %v206_v24 = vmul.f32 %v483_v20, %v150_v57 }
  0xf7   :  { %v152_v60 = vpop.f32.mrf.mxu0 }
  0xf8   :  { %v212_v27 = vmul.f32 2.0, %v206_v24 }
  0xf9   :  { %v155_v63 = vpop.f32.mrf.mxu0 }
  0xfa   :  { %v207_v22 = vmul.f32 %v481_v18, %v155_v63 }
  0xfb   :  { %v157_v1 = vpop.f32.mrf.mxu0 }
  0xfc   :  { %v213_v36 = vmul.f32 2.0, %v207_v22 }
  0xfd   :  { %v160_v3 = vpop.f32.mrf.mxu0 }
  0xfe   :  { %v208_v19 = vmul.f32 %v479_v14, %v160_v3 }
  0xff   :  { %v162_v4 = vpop.f32.mrf.mxu0 }
 0x101   :  { %v165_v5 = vpop.f32.mrf.mxu0 }
 0x102   :  { %v209_v17 = vmul.f32 %v716_v8, %v165_v5 }
 0x103   :  { %v167_v6 = vpop.f32.mrf.mxu0 }
 0x104   :  { %v215_v44 = vmul.f32 2.0, %v209_v17 }
 0x105   :  { %v170_v9 = vpop.f32.mrf.mxu0 }
 0x106   :  { %v210_v13 = vmul.f32 %v714_v7, %v170_v9 }
 0x107   :  { %v172_v16 = vpop.f32.mrf.mxu0 }
 0x108   :  { %452 = vmatprep.subr.mxu1 %v210_v13  ;;  %v216_v38 = vmul.f32 2.0, %v210_v13 }
 0x109   :  { %453 = vmatpush3.msra.mxu1 %v210_v13 }
 0x10a   :  { %454 = vmatprep.subr.mxu1 %v209_v17 }
 0x10b   :  { %455 = vmatpush3.msra.mxu1 %v209_v17 }
 0x10c   :  { %456 = vmatprep.subr.mxu1 %v208_v19 }
 0x10d   :  { %457 = vmatpush3.msra.mxu1 %v208_v19 }
 0x10e   :  { %458 = vmatprep.subr.mxu1 %v207_v22 }
 0x10f   :  { %459 = vmatpush3.msra.mxu1 %v207_v22 }
 0x110   :  { %460 = vmatprep.subr.mxu1 %v206_v24 }
 0x111   :  { %461 = vmatpush3.msra.mxu1 %v206_v24 }
 0x112   :  { %462 = vmatprep.subr.mxu1 %v205_v25 }
 0x113   :  { %463 = vmatpush3.msra.mxu1 %v205_v25 }
 0x114   :  { %465 = vmatmul.mubr.msk.f32.vlgmr.msra.gmra.mxu1 %vm174_vm1, %v614_v21 }
 0x115   :  { %467 = vmatprep.mubr.msk.f32.mxu1 %vm174_vm1, %v584_v12  ;;  %v439_v12 = vld [vmem:[%s762_s3] ss:$0 sm:$0xff] }
 0x118   :  { %468 = vmatmul.mubr.msk.f32.gmra.mxu1 %vm174_vm1, %v574_v10  ;;  %v214_v10 = vmul.f32 2.0, %v208_v19 }
 0x119   :  { %470 = vmatprep.mubr.msk.f32.mxu1 %vm174_vm1, %v593_v15 }
 0x11c   :  { %471 = vmatmul.mubr.msk.f32.gmra.mxu1 %vm174_vm1, %v579_v11 }
 0x1d4   :  { %v466_v28 = vpop.f32.mrf.mxu1 }
 0x1d5   :  { %v307_v30 = vadd.f32 %v466_v28, %v212_v27 }
 0x1d6   :  { %v301_v32 = vpop.f32.mrf.mxu1 }
 0x1d7   :  { %v331_v21 = vmul.f32 %v483_v20, %v307_v30  ;;  %v302_v33 = vadd.f32 %v301_v32, %v211_v31 }
 0x1d8   :  { %v469_v34 = vpop.f32.mrf.mxu1 }
 0x1d9   :  { %v330_v15 = vmul.f32 %v485_v23, %v302_v33  ;;  %v317_v35 = vadd.f32 %v469_v34, %v214_v10  ;;  %v343_v11 = vadd.f32 %v439_v12, %v331_v21 }
 0x1da   :  { %v311_v37 = vpop.f32.mrf.mxu1 }
 0x1db   :  { %v333_v39 = vmul.f32 %v479_v14, %v317_v35  ;;  %v312_v40 = vadd.f32 %v311_v37, %v213_v36  ;;  %v352_v41 = vsel %vm350_vm2, %v343_v11, -inf  ;;  %v342_v42 = vadd.f32 %v439_v12, %v330_v15 }
 0x1dc   :  { %359 = vmax.xlane.f32.xlu1 %v352_v41  ;;  %v472_v43 = vpop.f32.mrf.mxu1 }
 0x1dd   :  { %v332_v45 = vmul.f32 %v481_v18, %v312_v40  ;;  %v327_v46 = vadd.f32 %v472_v43, %v216_v38  ;;  %v351_v47 = vsel %vm350_vm2, %v342_v42, -inf  ;;  %v345_v48 = vadd.f32 %v439_v12, %v333_v39 }
 0x1de   :  { %v321_v49 = vpop.f32.mrf.mxu1  ;;  %357 = vmax.xlane.f32.xlu0 %v351_v47 }
 0x1df   :  { %v335_v50 = vmul.f32 %v714_v7, %v327_v46  ;;  %v322_v51 = vadd.f32 %v321_v49, %v215_v44  ;;  %v354_v52 = vsel %vm350_vm2, %v345_v48, -inf  ;;  %v344_v53 = vadd.f32 %v439_v12, %v332_v45 }
 0x1e0   :  { %363 = vmax.xlane.f32.xlu1 %v354_v52 }
 0x1e1   :  { %v334_v54 = vmul.f32 %v716_v8, %v322_v51  ;;  %v353_v55 = vsel %vm350_vm2, %v344_v53, -inf  ;;  %v347_v56 = vadd.f32 %v439_v12, %v335_v50 }
 0x1e2   :  { %361 = vmax.xlane.f32.xlu0 %v353_v55 }
 0x1e3   :  { %v356_v57 = vsel %vm350_vm2, %v347_v56, -inf  ;;  %v346_v58 = vadd.f32 %v439_v12, %v334_v54 }
 0x1e4   :  { %367 = vmax.xlane.f32.xlu1 %v356_v57 }
 0x1e5   :  { %v355_v59 = vsel %vm350_vm2, %v346_v58, -inf }
 0x1e6   :  { %365 = vmax.xlane.f32.xlu0 %v355_v59 }
 0x265   :  { %v360_v60 = vpop.xlane.xlu1 %359 }
 0x266   :  { %v370_v61 = vsub.f32 %v352_v41, %v360_v60 }
 0x267   :  { %v358_v62 = vpop.xlane.xlu0 %357 }
 0x268   :  { %v377_v63 = vmul.f32 1.442695, %v370_v61  ;;  %v369_v0 = vsub.f32 %v351_v47, %v358_v62 }
 0x269   :  { %v364_v1 = vpop.xlane.xlu1 %363 }
 0x26a   :  { %486 = vpow2.f32 %v377_v63  ;;  %v375_v2 = vmul.f32 1.442695, %v369_v0  ;;  %v372_v3 = vsub.f32 %v354_v52, %v364_v1 }
 0x26b   :  { %v362_v4 = vpop.xlane.xlu0 %361 }
 0x26c   :  { %488 = vpow2.f32 %v375_v2  ;;  %v381_v5 = vmul.f32 1.442695, %v372_v3  ;;  %v371_v6 = vsub.f32 %v353_v55, %v362_v4 }
 0x26d   :  { %v368_v7 = vpop.xlane.xlu1 %367 }
 0x26e   :  { %490 = vpow2.f32 %v381_v5  ;;  %v379_v8 = vmul.f32 1.442695, %v371_v6  ;;  %v374_v9 = vsub.f32 %v356_v57, %v368_v7 }
 0x26f   :  { %v366_v13 = vpop.xlane.xlu0 %365 }
 0x270   :  { %492 = vpow2.f32 %v379_v8  ;;  %v385_v14 = vmul.f32 1.442695, %v374_v9  ;;  %v373_v16 = vsub.f32 %v355_v59, %v366_v13 }
 0x272   :  { %494 = vpow2.f32 %v385_v14  ;;  %v383_v17 = vmul.f32 1.442695, %v373_v16 }
 0x274   :  { %496 = vpow2.f32 %v383_v17 }
 0x277   :  { %v487_v18 = vpop.eup %486 }
 0x278   :  { %389 = vadd.xlane.f32.xlu1 %v487_v18 }
 0x279   :  { %v489_v19 = vpop.eup %488 }
 0x27a   :  { %387 = vadd.xlane.f32.xlu0 %v489_v19 }
 0x27b   :  { %v491_v20 = vpop.eup %490 }
 0x27c   :  { %393 = vadd.xlane.f32.xlu1 %v491_v20 }
 0x27d   :  { %v493_v22 = vpop.eup %492 }
 0x27e   :  { %391 = vadd.xlane.f32.xlu0 %v493_v22 }
 0x27f   :  { %v495_v23 = vpop.eup %494 }
 0x280   :  { %397 = vadd.xlane.f32.xlu1 %v495_v23 }
 0x281   :  { %v497_v24 = vpop.eup %496 }
 0x282   :  { %395 = vadd.xlane.f32.xlu0 %v497_v24 }
 0x301   :  { %v390_v25 = vpop.xlane.xlu1 %389 }
 0x302   :  { %498 = vlog2.f32 %v390_v25 }
 0x303   :  { %v388_v26 = vpop.xlane.xlu0 %387 }
 0x304   :  { %500 = vlog2.f32 %v388_v26 }
 0x305   :  { %v394_v27 = vpop.xlane.xlu1 %393 }
 0x306   :  { %502 = vlog2.f32 %v394_v27 }
 0x307   :  { %v392_v28 = vpop.xlane.xlu0 %391 }
 0x308   :  { %504 = vlog2.f32 %v392_v28 }
 0x309   :  { %v398_v29 = vpop.xlane.xlu1 %397 }
 0x30a   :  { %506 = vlog2.f32 %v398_v29 }
 0x30b   :  { %v396_v30 = vpop.xlane.xlu0 %395 }
 0x30c   :  { %508 = vlog2.f32 %v396_v30 }
 0x30f   :  { %v499_v31 = vpop.eup %498 }
 0x310   :  { %v402_v32 = vmul.f32 0.6931472, %v499_v31 }
 0x311   :  { %v501_v12 = vpop.eup %500 }
 0x312   :  { %v412_v21 = vsub.f32 %v370_v61, %v402_v32  ;;  %v400_v33 = vmul.f32 0.6931472, %v501_v12 }
 0x313   :  { %v503_v10 = vpop.eup %502 }
 0x314   :  { %418 = vst [vmem:[%s763_s4 + $0x8] sm:$0xff] %v412_v21  ;;  %v411_v34 = vsub.f32 %v369_v0, %v400_v33  ;;  %v406_v15 = vmul.f32 0.6931472, %v503_v10 }
 0x315   :  { %v505_v35 = vpop.eup %504 }
 0x316   :  { %417 = vst [vmem:[%s763_s4] sm:$0xff] %v411_v34  ;;  %v414_v36 = vsub.f32 %v372_v3, %v406_v15  ;;  %v404_v11 = vmul.f32 0.6931472, %v505_v35 }
 0x317   :  { %v507_v37 = vpop.eup %506 }
 0x318   :  { %420 = vst [vmem:[%s763_s4 + $0x18] sm:$0xff] %v414_v36  ;;  %v413_v38 = vsub.f32 %v371_v6, %v404_v11  ;;  %v410_v39 = vmul.f32 0.6931472, %v507_v37 }
 0x319   :  { %v509_v40 = vpop.eup %508 }
 0x31a   :  { %419 = vst [vmem:[%s763_s4 + $0x10] sm:$0xff] %v413_v38  ;;  %v416_v41 = vsub.f32 %v374_v9, %v410_v39  ;;  %v408_v42 = vmul.f32 0.6931472, %v509_v40 }
 0x31c   :  { %422 = vst [vmem:[%s763_s4 + $0x28] sm:$0xff] %v416_v41  ;;  %v415_v43 = vsub.f32 %v373_v16, %v408_v42 }
 0x31e   :  { %421 = vst [vmem:[%s763_s4 + $0x20] sm:$0xff] %v415_v43 }

</bundles_post_ra>
